<compile_context>
chip_gen: v7x
topology: tpu7x:2x2x1
jax: 0.10.0
libtpu: 0.0.40
codegen_flags: <defaults>
</compile_context>

<pallas_src>
import jax
import jax.numpy as jnp
import numpy as np
from jax.experimental import pallas as pl
from jax.experimental.pallas import tpu as pltpu


# ---------------------------------------------------------------------------
# helpers
# ---------------------------------------------------------------------------

def _round_up(v, m):
    return ((v + m - 1) // m) * m


def _decimation_matrix(We):
    """Shared 0/1 lane-decimation matrix (2*We, 4*Wo).

    Column q*Wo + u (q = 2*kh + kw) selects row kh*We + 2*u + kw, i.e. it maps
    the row-pair-merged lane layout [row 2t | row 2t+1] to the four stride-2
    taps x[2t+kh, 2u+kw].
    """
    Wo = We // 2
    R = np.zeros((2 * We, 4 * Wo), np.float32)
    for q in range(4):
        kh, kw = q // 2, q % 2
        for u in range(Wo):
            R[kh * We + 2 * u + kw, q * Wo + u] = 1.0
    return R


def _chip_info():
    """(scoped-vmem ceiling, multi_tensorcore?) with conservative fallbacks."""
    kind = ""
    try:
        kind = jax.devices()[0].device_kind.lower()
    except Exception:
        pass
    multi_core = ("v7" in kind) or ("7x" in kind)

    vmem_cap = 128 << 20
    try:
        vmem_cap = int(pltpu.get_tpu_info().vmem_capacity_bytes)
    except Exception:
        if multi_core:
            vmem_cap = 64 << 20

    if multi_core or vmem_cap <= (64 << 20):
        limit_cap = 32 << 20                      # v7x: 64 MiB/TC physical
    else:
        limit_cap = min(100 << 20, vmem_cap - (24 << 20))   # v5e/v6e: 128 MiB
    return limit_cap, multi_core


def _working_set_bytes(nb, C, th, We, compute_bf16, in_item, out_item):
    """Padded VMEM residency of one grid step (all live buffers counted)."""
    Wo = We // 2
    sub_t = _round_up(th, 8)
    lane_in = _round_up(2 * We, 128)
    lane_t = _round_up(4 * Wo, 128)
    lane_o = _round_up(Wo, 128)
    b = 0
    b += 2 * nb * C * sub_t * lane_in * in_item         # double-buffered input
    if compute_bf16 and in_item > 2:
        b += nb * C * sub_t * lane_in * 2               # bf16 MXU-operand copy
    b += _round_up(nb * C * th, 8) * lane_t * 4         # decimation result (f32)
    b += 4 * nb * C * sub_t * lane_o * 4                # hoisted tap quadrants
    b += 2 * nb * C * sub_t * lane_o * 4                # acc + stacked output tile
    b += 2 * nb * C * sub_t * lane_o * out_item         # double-buffered output
    b += 2 * _round_up(2 * We, 8) * lane_t * 4          # shared R (tiny)
    return b


def _plan_tiles(N, C, Ho, We, compute_bf16, in_item, out_item):
    """Pick (NB, TH, vmem_limit) from the real working set and the chip."""
    limit_cap, multi_core = _chip_info()
    budget = (limit_cap * 3) // 4                       # headroom for compiler

    th_cands = sorted({d for d in range(8, Ho + 1, 8) if Ho % d == 0} | {Ho})
    nb_cands = sorted(d for d in range(1, N + 1) if N % d == 0)

    def ws(nb, th):
        return _working_set_bytes(nb, C, th, We, compute_bf16, in_item, out_item)

    fitting = [(nb, th) for nb in nb_cands for th in th_cands
               if ws(nb, th) <= budget]
    if fitting:
        nb, th = max(fitting, key=lambda p: (p[0] * p[1], p[1]))
    else:
        nb, th = 1, th_cands[0]                         # smallest legal tile

    # >= 2 grid steps only pays off when there are two TensorCores (v7x).
    if multi_core and (N // nb) * (Ho // th) < 2:
        split = [p for p in fitting if (N // p[0]) * (Ho // p[1]) >= 2]
        if split:
            nb, th = max(split, key=lambda p: (p[0] * p[1], p[1]))

    need = ws(nb, th)
    vmem_limit = int(min(limit_cap, max(8 << 20, need + need // 2 + (2 << 20))))
    return nb, th, vmem_limit


# ---------------------------------------------------------------------------
# kernel
# ---------------------------------------------------------------------------

def _decimate(x_ref, r_ref):
    """Four stride-2 taps of the row-pair-merged tile via one shared matmul.

    x_ref: (NB, C, TH, 2*W) input tile (VMEM), rows 2t / 2t+1 merged on lanes.
    r_ref: (2*W, 4*Wo) shared 0/1 lane-decimation matrix (VMEM).
    Returns [tap_q] for q = 2*kh + kw, each (NB, C, TH, Wo) float32 with
    tap_q[n, c, t, u] == x[n, c, 2t+kh, 2u+kw] (exact: 0/1 selection).
    """
    NB, C, TH, W2 = x_ref.shape
    Wo = r_ref.shape[1] // 4
    r = r_ref[...]
    x = x_ref[...]

    pack = max(1, 4 // x.dtype.itemsize)       # sublane packing of input dtype
    if TH % (8 * pack) == 0:
        # Single tall-skinny matmul: (NB*C*TH, 2W) @ (2W, 4Wo).  The leading-
        # dim merge is a pure vreg relabel (TH is sublane-tile aligned); the
        # cast to the MXU operand dtype (bf16 under the autocast analogue)
        # happens after it and accumulation stays f32.
        x2 = x.reshape(NB * C * TH, W2).astype(r.dtype)
        t = jnp.dot(x2, r, preferred_element_type=jnp.float32)
        t = t.reshape(NB, C, TH, 4 * Wo)
    else:
        # Tiny-Ho fallback (TH not sublane aligned): a few 2-D dots per tile.
        xc = x.astype(r.dtype)
        t = jnp.stack(
            [jnp.stack([jnp.dot(xc[n, c], r,
                                preferred_element_type=jnp.float32)
                        for c in range(C)], axis=0)
             for n in range(NB)], axis=0)

    # Hoist the four (kh, kw) quadrants once (4 static lane slices total).
    return [t[..., q * Wo:(q + 1) * Wo] for q in range(4)]


def _pool_conv_kernel(w_ref, b_ref, r_ref, x_ref, o_ref):
    """One (batch-tile, row-tile) block of the 2x2/stride-2 conv.

    w_ref: (C*C*4,) flattened conv weight, (co, ci, kh, kw) order   [SMEM]
    b_ref: (C,) bias                                                 [SMEM]
    r_ref: (2*W, 4*Wo) shared lane-decimation matrix                 [VMEM]
    x_ref: (NB, C, TH, 2*W) row-pair-merged input tile               [VMEM]
    o_ref: (NB, C, TH, Wo) output tile (NCHW)                        [VMEM]
    """
    NB, C, TH, Wo = o_ref.shape
    quads = _decimate(x_ref, r_ref)            # 4 x (NB, C, TH, Wo) f32

    # Channel mixing on the VPU with SMEM scalar weights; f32 accumulation,
    # bias added in f32, single downcast at the (single, full-block) store.
    outs = []
    for co in range(C):
        acc = jnp.zeros((NB, TH, Wo), jnp.float32)
        for q in range(4):
            qd = quads[q]
            for ci in range(C):
                acc = acc + w_ref[(co * C + ci) * 4 + q] * qd[:, ci]
        outs.append(acc + b_ref[co])
    o_ref[...] = jnp.stack(outs, axis=1).astype(o_ref.dtype)


# ---------------------------------------------------------------------------
# wrapper
# ---------------------------------------------------------------------------

def _conv2x2_stride2(x, weight, bias, *, half_precision=False):
    """Conv2d(C, C, kernel=2, stride=2, pad=0, bias=True) on NCHW input."""
    N, C, H, W = x.shape
    He, We = (H // 2) * 2, (W // 2) * 2
    if He != H or We != W:                      # VALID conv drops trailing row/col
        x = x[:, :, :He, :We]
    Ho, Wo = He // 2, We // 2

    out_dtype = jnp.bfloat16 if half_precision else x.dtype
    compute_bf16 = half_precision or (x.dtype == jnp.bfloat16)

    # Row-pair merge: (N, C, 2*Ho, We) -> (N, C, Ho, 2*We).  Free (contiguous).
    x_m = x.reshape(N, C, Ho, 2 * We)

    NB, TH, vmem_limit = _plan_tiles(
        N, C, Ho, We, compute_bf16,
        x.dtype.itemsize, jnp.dtype(out_dtype).itemsize)
    grid = (N // NB, Ho // TH)

    # Shared decimation matrix; its dtype sets the MXU operand dtype.
    r_dtype = jnp.bfloat16 if compute_bf16 else jnp.float32
    R = jnp.asarray(_decimation_matrix(We), dtype=r_dtype)

    # Tiny parameter arrays live in SMEM.  Autocast analogue: round them to
    # bf16 first, but keep the in-kernel FMA accumulation + bias add in f32.
    # TODO(synk): for very large C the flattened SMEM weight may exceed SMEM;
    # the MXU channel-mix path (see module TODO) would move it to VMEM.
    w_flat = weight.reshape(-1)
    b_vec = bias.reshape(-1)
    if half_precision:
        w_flat = w_flat.astype(jnp.bfloat16)
        b_vec = b_vec.astype(jnp.bfloat16)
    w_flat = w_flat.astype(jnp.float32)
    b_vec = b_vec.astype(jnp.float32)

    return pl.pallas_call(
        _pool_conv_kernel,
        out_shape=jax.ShapeDtypeStruct((N, C, Ho, Wo), out_dtype),
        grid_spec=pltpu.PrefetchScalarGridSpec(
            num_scalar_prefetch=0,
            grid=grid,
            in_specs=[
                pl.BlockSpec(memory_space=pltpu.MemorySpace.SMEM),    # weight
                pl.BlockSpec(memory_space=pltpu.MemorySpace.SMEM),    # bias
                pl.BlockSpec((2 * We, 4 * Wo), lambda b, h: (0, 0)),  # R
                pl.BlockSpec((NB, C, TH, 2 * We), lambda b, h: (b, 0, h, 0)),
            ],
            out_specs=pl.BlockSpec((NB, C, TH, Wo), lambda b, h: (b, 0, h, 0)),
        ),
        compiler_params=pltpu.CompilerParams(
            dimension_semantics=("parallel", "parallel"),
            vmem_limit_bytes=vmem_limit,
        ),
    )(w_flat, b_vec, R, x_m)


class PoolingBlockPallas:
    """JAX/Pallas port of verydeepvae PoolingBlock (2-D path)."""

    def __init__(self, *, channels=None, half_precision=False, key=None):
        self.channels = channels
        self.half_precision = half_precision
        if channels is not None:
            key = jax.random.PRNGKey(0) if key is None else key
            kw, kb = jax.random.split(key)
            # nn.Conv2d-shaped params: weight (C, C, 2, 2), bias (C,)
            fan_in = channels * 2 * 2
            bound = 1.0 / np.sqrt(fan_in)
            self.weight = jax.random.uniform(
                kw, (channels, channels, 2, 2), jnp.float32, -bound, bound)
            self.bias = jax.random.uniform(
                kb, (channels,), jnp.float32, -bound, bound)
        else:
            self.weight = None
            self.bias = None

    def __call__(self, input_dictionary):
        x = input_dictionary["data"]
        if self.channels is not None:
            y = _conv2x2_stride2(x, self.weight, self.bias,
                                 half_precision=self.half_precision)
        else:
            # nearest-neighbour 0.5x downsample == take every other pixel.
            # TODO(synk): pure strided slice, no arithmetic hot path to fuse.
            H, W = x.shape[-2], x.shape[-1]
            y = x[:, :, :(H // 2) * 2:2, :(W // 2) * 2:2]
        input_dictionary["data"] = y
        return input_dictionary


if __name__ == "__main__":
    key = jax.random.PRNGKey(0)
    k_x, k_params = jax.random.split(key)

    N, C, H, W = 2, 4, 16, 16
    x = jax.random.normal(k_x, (N, C, H, W), jnp.float32)

    # --- conv (channels) branch, f32 ----------------------------------------
    block = PoolingBlockPallas(channels=C, half_precision=False, key=k_params)
    out_dict = block({"data": x})
    y = jax.block_until_ready(out_dict["data"])
    assert y.shape == (N, C, H // 2, W // 2), y.shape

    ref = jax.lax.conv_general_dilated(
        x, block.weight, window_strides=(2, 2), padding="VALID",
        dimension_numbers=("NCHW", "OIHW", "NCHW"),
    ) + block.bias[None, :, None, None]
    np.testing.assert_allclose(np.asarray(y), np.asarray(ref),
                               rtol=1e-5, atol=1e-5)

    # --- conv branch, half precision (autocast analogue) --------------------
    block_hp = PoolingBlockPallas(channels=C, half_precision=True, key=k_params)
    y_hp = jax.block_until_ready(block_hp({"data": x})["data"])
    assert y_hp.dtype == jnp.bfloat16 and y_hp.shape == (N, C, H // 2, W // 2)
    np.testing.assert_allclose(np.asarray(y_hp.astype(jnp.float32)),
                               np.asarray(ref), rtol=1e-1, atol=1e-1)

    # --- "no channels" (nearest downsample) branch ---------------------------
    block_ds = PoolingBlockPallas(channels=None)
    y_ds = jax.block_until_ready(block_ds({"data": x})["data"])
    np.testing.assert_array_equal(np.asarray(y_ds),
                                  np.asarray(x)[:, :, ::2, ::2])

    print("KERNEL_OK")
</pallas_src>

<mosaic_0001>
module attributes {stable_mosaic.version = 11 : i64} {
  func.func @_pool_conv_kernel(%arg0: i32, %arg1: i32, %arg2: memref<64xf32, #tpu.memory_space<smem>>, %arg3: memref<4xf32, #tpu.memory_space<smem>>, %arg4: memref<32x32xf32, #tpu.memory_space<vmem>>, %arg5: memref<2x4x8x32xf32, #tpu.memory_space<vmem>>, %arg6: memref<2x4x8x8xf32, #tpu.memory_space<vmem>>) attributes {dimension_semantics = [#tpu.dimension_semantics<parallel>, #tpu.dimension_semantics<parallel>], iteration_bounds = array<i64: 1, 1>, scalar_prefetch = 0 : i64, scratch_operands = 0 : i64, tpu.core_type = #tpu.core_type<tc>, window_params = [{transform_indices = @transform_0, window_bounds = array<i64: 64>}, {transform_indices = @transform_1, window_bounds = array<i64: 4>}, {pipeline_mode = #tpu.pipeline_mode<synchronous>, transform_indices = @transform_2, window_bounds = array<i64: 32, 32>}, {transform_indices = @transform_3, window_bounds = array<i64: 2, 4, 8, 32>}, {transform_indices = @transform_4, window_bounds = array<i64: 2, 4, 8, 8>}]} {
    %c0 = arith.constant 0 : index
    %c0_0 = arith.constant 0 : index
    %0 = vector.load %arg4[%c0, %c0_0] : memref<32x32xf32, #tpu.memory_space<vmem>>, vector<32x32xf32>
    %c0_1 = arith.constant 0 : index
    %c0_2 = arith.constant 0 : index
    %c0_3 = arith.constant 0 : index
    %c0_4 = arith.constant 0 : index
    %1 = vector.load %arg5[%c0_1, %c0_2, %c0_3, %c0_4] : memref<2x4x8x32xf32, #tpu.memory_space<vmem>>, vector<2x4x8x32xf32>
    %2 = vector.shape_cast %1 : vector<2x4x8x32xf32> to vector<64x32xf32>
    %cst = arith.constant dense<0.000000e+00> : vector<64x32xf32>
    %3 = tpu.matmul %2, %0, %cst {dimension_numbers = #tpu.dot_dimension_numbers<[1], [0], [0], [1], [0, 0, 1, 1], [], []>} : vector<64x32xf32>, vector<32x32xf32>, vector<64x32xf32> -> vector<64x32xf32>
    %4 = vector.shape_cast %3 : vector<64x32xf32> to vector<2x4x8x32xf32>
    %5 = vector.extract_strided_slice %4 {offsets = [0, 0, 0, 0], sizes = [2, 4, 8, 8], strides = [1, 1, 1, 1]} : vector<2x4x8x32xf32> to vector<2x4x8x8xf32>
    %6 = vector.extract_strided_slice %4 {offsets = [0, 0, 0, 8], sizes = [2, 4, 8, 8], strides = [1, 1, 1, 1]} : vector<2x4x8x32xf32> to vector<2x4x8x8xf32>
    %7 = vector.extract_strided_slice %4 {offsets = [0, 0, 0, 16], sizes = [2, 4, 8, 8], strides = [1, 1, 1, 1]} : vector<2x4x8x32xf32> to vector<2x4x8x8xf32>
    %8 = vector.extract_strided_slice %4 {offsets = [0, 0, 0, 24], sizes = [2, 4, 8, 8], strides = [1, 1, 1, 1]} : vector<2x4x8x32xf32> to vector<2x4x8x8xf32>
    %cst_5 = arith.constant 0.000000e+00 : f32
    %9 = vector.broadcast %cst_5 : f32 to vector<2x8x8xf32>
    %c0_6 = arith.constant 0 : index
    %10 = memref.load %arg2[%c0_6] : memref<64xf32, #tpu.memory_space<smem>>
    %11 = vector.extract_strided_slice %5 {offsets = [0, 0, 0, 0], sizes = [2, 1, 8, 8], strides = [1, 1, 1, 1]} : vector<2x4x8x8xf32> to vector<2x1x8x8xf32>
    %12 = vector.shape_cast %11 : vector<2x1x8x8xf32> to vector<2x8x8xf32>
    %13 = vector.broadcast %10 : f32 to vector<2x8x8xf32>
    %14 = arith.mulf %13, %12 : vector<2x8x8xf32>
    %15 = arith.addf %9, %14 : vector<2x8x8xf32>
    %c4 = arith.constant 4 : index
    %16 = memref.load %arg2[%c4] : memref<64xf32, #tpu.memory_space<smem>>
    %17 = vector.extract_strided_slice %5 {offsets = [0, 1, 0, 0], sizes = [2, 1, 8, 8], strides = [1, 1, 1, 1]} : vector<2x4x8x8xf32> to vector<2x1x8x8xf32>
    %18 = vector.shape_cast %17 : vector<2x1x8x8xf32> to vector<2x8x8xf32>
    %19 = vector.broadcast %16 : f32 to vector<2x8x8xf32>
    %20 = arith.mulf %19, %18 : vector<2x8x8xf32>
    %21 = arith.addf %15, %20 : vector<2x8x8xf32>
    %c8 = arith.constant 8 : index
    %22 = memref.load %arg2[%c8] : memref<64xf32, #tpu.memory_space<smem>>
    %23 = vector.extract_strided_slice %5 {offsets = [0, 2, 0, 0], sizes = [2, 1, 8, 8], strides = [1, 1, 1, 1]} : vector<2x4x8x8xf32> to vector<2x1x8x8xf32>
    %24 = vector.shape_cast %23 : vector<2x1x8x8xf32> to vector<2x8x8xf32>
    %25 = vector.broadcast %22 : f32 to vector<2x8x8xf32>
    %26 = arith.mulf %25, %24 : vector<2x8x8xf32>
    %27 = arith.addf %21, %26 : vector<2x8x8xf32>
    %c12 = arith.constant 12 : index
    %28 = memref.load %arg2[%c12] : memref<64xf32, #tpu.memory_space<smem>>
    %29 = vector.extract_strided_slice %5 {offsets = [0, 3, 0, 0], sizes = [2, 1, 8, 8], strides = [1, 1, 1, 1]} : vector<2x4x8x8xf32> to vector<2x1x8x8xf32>
    %30 = vector.shape_cast %29 : vector<2x1x8x8xf32> to vector<2x8x8xf32>
    %31 = vector.broadcast %28 : f32 to vector<2x8x8xf32>
    %32 = arith.mulf %31, %30 : vector<2x8x8xf32>
    %33 = arith.addf %27, %32 : vector<2x8x8xf32>
    %c1 = arith.constant 1 : index
    %34 = memref.load %arg2[%c1] : memref<64xf32, #tpu.memory_space<smem>>
    %35 = vector.extract_strided_slice %6 {offsets = [0, 0, 0, 0], sizes = [2, 1, 8, 8], strides = [1, 1, 1, 1]} : vector<2x4x8x8xf32> to vector<2x1x8x8xf32>
    %36 = vector.shape_cast %35 : vector<2x1x8x8xf32> to vector<2x8x8xf32>
    %37 = vector.broadcast %34 : f32 to vector<2x8x8xf32>
    %38 = arith.mulf %37, %36 : vector<2x8x8xf32>
    %39 = arith.addf %33, %38 : vector<2x8x8xf32>
    %c5 = arith.constant 5 : index
    %40 = memref.load %arg2[%c5] : memref<64xf32, #tpu.memory_space<smem>>
    %41 = vector.extract_strided_slice %6 {offsets = [0, 1, 0, 0], sizes = [2, 1, 8, 8], strides = [1, 1, 1, 1]} : vector<2x4x8x8xf32> to vector<2x1x8x8xf32>
    %42 = vector.shape_cast %41 : vector<2x1x8x8xf32> to vector<2x8x8xf32>
    %43 = vector.broadcast %40 : f32 to vector<2x8x8xf32>
    %44 = arith.mulf %43, %42 : vector<2x8x8xf32>
    %45 = arith.addf %39, %44 : vector<2x8x8xf32>
    %c9 = arith.constant 9 : index
    %46 = memref.load %arg2[%c9] : memref<64xf32, #tpu.memory_space<smem>>
    %47 = vector.extract_strided_slice %6 {offsets = [0, 2, 0, 0], sizes = [2, 1, 8, 8], strides = [1, 1, 1, 1]} : vector<2x4x8x8xf32> to vector<2x1x8x8xf32>
    %48 = vector.shape_cast %47 : vector<2x1x8x8xf32> to vector<2x8x8xf32>
    %49 = vector.broadcast %46 : f32 to vector<2x8x8xf32>
    %50 = arith.mulf %49, %48 : vector<2x8x8xf32>
    %51 = arith.addf %45, %50 : vector<2x8x8xf32>
    %c13 = arith.constant 13 : index
    %52 = memref.load %arg2[%c13] : memref<64xf32, #tpu.memory_space<smem>>
    %53 = vector.extract_strided_slice %6 {offsets = [0, 3, 0, 0], sizes = [2, 1, 8, 8], strides = [1, 1, 1, 1]} : vector<2x4x8x8xf32> to vector<2x1x8x8xf32>
    %54 = vector.shape_cast %53 : vector<2x1x8x8xf32> to vector<2x8x8xf32>
    %55 = vector.broadcast %52 : f32 to vector<2x8x8xf32>
    %56 = arith.mulf %55, %54 : vector<2x8x8xf32>
    %57 = arith.addf %51, %56 : vector<2x8x8xf32>
    %c2 = arith.constant 2 : index
    %58 = memref.load %arg2[%c2] : memref<64xf32, #tpu.memory_space<smem>>
    %59 = vector.extract_strided_slice %7 {offsets = [0, 0, 0, 0], sizes = [2, 1, 8, 8], strides = [1, 1, 1, 1]} : vector<2x4x8x8xf32> to vector<2x1x8x8xf32>
    %60 = vector.shape_cast %59 : vector<2x1x8x8xf32> to vector<2x8x8xf32>
    %61 = vector.broadcast %58 : f32 to vector<2x8x8xf32>
    %62 = arith.mulf %61, %60 : vector<2x8x8xf32>
    %63 = arith.addf %57, %62 : vector<2x8x8xf32>
    %c6 = arith.constant 6 : index
    %64 = memref.load %arg2[%c6] : memref<64xf32, #tpu.memory_space<smem>>
    %65 = vector.extract_strided_slice %7 {offsets = [0, 1, 0, 0], sizes = [2, 1, 8, 8], strides = [1, 1, 1, 1]} : vector<2x4x8x8xf32> to vector<2x1x8x8xf32>
    %66 = vector.shape_cast %65 : vector<2x1x8x8xf32> to vector<2x8x8xf32>
    %67 = vector.broadcast %64 : f32 to vector<2x8x8xf32>
    %68 = arith.mulf %67, %66 : vector<2x8x8xf32>
    %69 = arith.addf %63, %68 : vector<2x8x8xf32>
    %c10 = arith.constant 10 : index
    %70 = memref.load %arg2[%c10] : memref<64xf32, #tpu.memory_space<smem>>
    %71 = vector.extract_strided_slice %7 {offsets = [0, 2, 0, 0], sizes = [2, 1, 8, 8], strides = [1, 1, 1, 1]} : vector<2x4x8x8xf32> to vector<2x1x8x8xf32>
    %72 = vector.shape_cast %71 : vector<2x1x8x8xf32> to vector<2x8x8xf32>
    %73 = vector.broadcast %70 : f32 to vector<2x8x8xf32>
    %74 = arith.mulf %73, %72 : vector<2x8x8xf32>
    %75 = arith.addf %69, %74 : vector<2x8x8xf32>
    %c14 = arith.constant 14 : index
    %76 = memref.load %arg2[%c14] : memref<64xf32, #tpu.memory_space<smem>>
    %77 = vector.extract_strided_slice %7 {offsets = [0, 3, 0, 0], sizes = [2, 1, 8, 8], strides = [1, 1, 1, 1]} : vector<2x4x8x8xf32> to vector<2x1x8x8xf32>
    %78 = vector.shape_cast %77 : vector<2x1x8x8xf32> to vector<2x8x8xf32>
    %79 = vector.broadcast %76 : f32 to vector<2x8x8xf32>
    %80 = arith.mulf %79, %78 : vector<2x8x8xf32>
    %81 = arith.addf %75, %80 : vector<2x8x8xf32>
    %c3 = arith.constant 3 : index
    %82 = memref.load %arg2[%c3] : memref<64xf32, #tpu.memory_space<smem>>
    %83 = vector.extract_strided_slice %8 {offsets = [0, 0, 0, 0], sizes = [2, 1, 8, 8], strides = [1, 1, 1, 1]} : vector<2x4x8x8xf32> to vector<2x1x8x8xf32>
    %84 = vector.shape_cast %83 : vector<2x1x8x8xf32> to vector<2x8x8xf32>
    %85 = vector.broadcast %82 : f32 to vector<2x8x8xf32>
    %86 = arith.mulf %85, %84 : vector<2x8x8xf32>
    %87 = arith.addf %81, %86 : vector<2x8x8xf32>
    %c7 = arith.constant 7 : index
    %88 = memref.load %arg2[%c7] : memref<64xf32, #tpu.memory_space<smem>>
    %89 = vector.extract_strided_slice %8 {offsets = [0, 1, 0, 0], sizes = [2, 1, 8, 8], strides = [1, 1, 1, 1]} : vector<2x4x8x8xf32> to vector<2x1x8x8xf32>
    %90 = vector.shape_cast %89 : vector<2x1x8x8xf32> to vector<2x8x8xf32>
    %91 = vector.broadcast %88 : f32 to vector<2x8x8xf32>
    %92 = arith.mulf %91, %90 : vector<2x8x8xf32>
    %93 = arith.addf %87, %92 : vector<2x8x8xf32>
    %c11 = arith.constant 11 : index
    %94 = memref.load %arg2[%c11] : memref<64xf32, #tpu.memory_space<smem>>
    %95 = vector.extract_strided_slice %8 {offsets = [0, 2, 0, 0], sizes = [2, 1, 8, 8], strides = [1, 1, 1, 1]} : vector<2x4x8x8xf32> to vector<2x1x8x8xf32>
    %96 = vector.shape_cast %95 : vector<2x1x8x8xf32> to vector<2x8x8xf32>
    %97 = vector.broadcast %94 : f32 to vector<2x8x8xf32>
    %98 = arith.mulf %97, %96 : vector<2x8x8xf32>
    %99 = arith.addf %93, %98 : vector<2x8x8xf32>
    %c15 = arith.constant 15 : index
    %100 = memref.load %arg2[%c15] : memref<64xf32, #tpu.memory_space<smem>>
    %101 = vector.extract_strided_slice %8 {offsets = [0, 3, 0, 0], sizes = [2, 1, 8, 8], strides = [1, 1, 1, 1]} : vector<2x4x8x8xf32> to vector<2x1x8x8xf32>
    %102 = vector.shape_cast %101 : vector<2x1x8x8xf32> to vector<2x8x8xf32>
    %103 = vector.broadcast %100 : f32 to vector<2x8x8xf32>
    %104 = arith.mulf %103, %102 : vector<2x8x8xf32>
    %105 = arith.addf %99, %104 : vector<2x8x8xf32>
    %c0_7 = arith.constant 0 : index
    %106 = memref.load %arg3[%c0_7] : memref<4xf32, #tpu.memory_space<smem>>
    %107 = vector.broadcast %106 : f32 to vector<2x8x8xf32>
    %108 = arith.addf %105, %107 : vector<2x8x8xf32>
    %cst_8 = arith.constant 0.000000e+00 : f32
    %109 = vector.broadcast %cst_8 : f32 to vector<2x8x8xf32>
    %c16 = arith.constant 16 : index
    %110 = memref.load %arg2[%c16] : memref<64xf32, #tpu.memory_space<smem>>
    %111 = vector.extract_strided_slice %5 {offsets = [0, 0, 0, 0], sizes = [2, 1, 8, 8], strides = [1, 1, 1, 1]} : vector<2x4x8x8xf32> to vector<2x1x8x8xf32>
    %112 = vector.shape_cast %111 : vector<2x1x8x8xf32> to vector<2x8x8xf32>
    %113 = vector.broadcast %110 : f32 to vector<2x8x8xf32>
    %114 = arith.mulf %113, %112 : vector<2x8x8xf32>
    %115 = arith.addf %109, %114 : vector<2x8x8xf32>
    %c20 = arith.constant 20 : index
    %116 = memref.load %arg2[%c20] : memref<64xf32, #tpu.memory_space<smem>>
    %117 = vector.extract_strided_slice %5 {offsets = [0, 1, 0, 0], sizes = [2, 1, 8, 8], strides = [1, 1, 1, 1]} : vector<2x4x8x8xf32> to vector<2x1x8x8xf32>
    %118 = vector.shape_cast %117 : vector<2x1x8x8xf32> to vector<2x8x8xf32>
    %119 = vector.broadcast %116 : f32 to vector<2x8x8xf32>
    %120 = arith.mulf %119, %118 : vector<2x8x8xf32>
    %121 = arith.addf %115, %120 : vector<2x8x8xf32>
    %c24 = arith.constant 24 : index
    %122 = memref.load %arg2[%c24] : memref<64xf32, #tpu.memory_space<smem>>
    %123 = vector.extract_strided_slice %5 {offsets = [0, 2, 0, 0], sizes = [2, 1, 8, 8], strides = [1, 1, 1, 1]} : vector<2x4x8x8xf32> to vector<2x1x8x8xf32>
    %124 = vector.shape_cast %123 : vector<2x1x8x8xf32> to vector<2x8x8xf32>
    %125 = vector.broadcast %122 : f32 to vector<2x8x8xf32>
    %126 = arith.mulf %125, %124 : vector<2x8x8xf32>
    %127 = arith.addf %121, %126 : vector<2x8x8xf32>
    %c28 = arith.constant 28 : index
    %128 = memref.load %arg2[%c28] : memref<64xf32, #tpu.memory_space<smem>>
    %129 = vector.extract_strided_slice %5 {offsets = [0, 3, 0, 0], sizes = [2, 1, 8, 8], strides = [1, 1, 1, 1]} : vector<2x4x8x8xf32> to vector<2x1x8x8xf32>
    %130 = vector.shape_cast %129 : vector<2x1x8x8xf32> to vector<2x8x8xf32>
    %131 = vector.broadcast %128 : f32 to vector<2x8x8xf32>
    %132 = arith.mulf %131, %130 : vector<2x8x8xf32>
    %133 = arith.addf %127, %132 : vector<2x8x8xf32>
    %c17 = arith.constant 17 : index
    %134 = memref.load %arg2[%c17] : memref<64xf32, #tpu.memory_space<smem>>
    %135 = vector.extract_strided_slice %6 {offsets = [0, 0, 0, 0], sizes = [2, 1, 8, 8], strides = [1, 1, 1, 1]} : vector<2x4x8x8xf32> to vector<2x1x8x8xf32>
    %136 = vector.shape_cast %135 : vector<2x1x8x8xf32> to vector<2x8x8xf32>
    %137 = vector.broadcast %134 : f32 to vector<2x8x8xf32>
    %138 = arith.mulf %137, %136 : vector<2x8x8xf32>
    %139 = arith.addf %133, %138 : vector<2x8x8xf32>
    %c21 = arith.constant 21 : index
    %140 = memref.load %arg2[%c21] : memref<64xf32, #tpu.memory_space<smem>>
    %141 = vector.extract_strided_slice %6 {offsets = [0, 1, 0, 0], sizes = [2, 1, 8, 8], strides = [1, 1, 1, 1]} : vector<2x4x8x8xf32> to vector<2x1x8x8xf32>
    %142 = vector.shape_cast %141 : vector<2x1x8x8xf32> to vector<2x8x8xf32>
    %143 = vector.broadcast %140 : f32 to vector<2x8x8xf32>
    %144 = arith.mulf %143, %142 : vector<2x8x8xf32>
    %145 = arith.addf %139, %144 : vector<2x8x8xf32>
    %c25 = arith.constant 25 : index
    %146 = memref.load %arg2[%c25] : memref<64xf32, #tpu.memory_space<smem>>
    %147 = vector.extract_strided_slice %6 {offsets = [0, 2, 0, 0], sizes = [2, 1, 8, 8], strides = [1, 1, 1, 1]} : vector<2x4x8x8xf32> to vector<2x1x8x8xf32>
    %148 = vector.shape_cast %147 : vector<2x1x8x8xf32> to vector<2x8x8xf32>
    %149 = vector.broadcast %146 : f32 to vector<2x8x8xf32>
    %150 = arith.mulf %149, %148 : vector<2x8x8xf32>
    %151 = arith.addf %145, %150 : vector<2x8x8xf32>
    %c29 = arith.constant 29 : index
    %152 = memref.load %arg2[%c29] : memref<64xf32, #tpu.memory_space<smem>>
    %153 = vector.extract_strided_slice %6 {offsets = [0, 3, 0, 0], sizes = [2, 1, 8, 8], strides = [1, 1, 1, 1]} : vector<2x4x8x8xf32> to vector<2x1x8x8xf32>
    %154 = vector.shape_cast %153 : vector<2x1x8x8xf32> to vector<2x8x8xf32>
    %155 = vector.broadcast %152 : f32 to vector<2x8x8xf32>
    %156 = arith.mulf %155, %154 : vector<2x8x8xf32>
    %157 = arith.addf %151, %156 : vector<2x8x8xf32>
    %c18 = arith.constant 18 : index
    %158 = memref.load %arg2[%c18] : memref<64xf32, #tpu.memory_space<smem>>
    %159 = vector.extract_strided_slice %7 {offsets = [0, 0, 0, 0], sizes = [2, 1, 8, 8], strides = [1, 1, 1, 1]} : vector<2x4x8x8xf32> to vector<2x1x8x8xf32>
    %160 = vector.shape_cast %159 : vector<2x1x8x8xf32> to vector<2x8x8xf32>
    %161 = vector.broadcast %158 : f32 to vector<2x8x8xf32>
    %162 = arith.mulf %161, %160 : vector<2x8x8xf32>
    %163 = arith.addf %157, %162 : vector<2x8x8xf32>
    %c22 = arith.constant 22 : index
    %164 = memref.load %arg2[%c22] : memref<64xf32, #tpu.memory_space<smem>>
    %165 = vector.extract_strided_slice %7 {offsets = [0, 1, 0, 0], sizes = [2, 1, 8, 8], strides = [1, 1, 1, 1]} : vector<2x4x8x8xf32> to vector<2x1x8x8xf32>
    %166 = vector.shape_cast %165 : vector<2x1x8x8xf32> to vector<2x8x8xf32>
    %167 = vector.broadcast %164 : f32 to vector<2x8x8xf32>
    %168 = arith.mulf %167, %166 : vector<2x8x8xf32>
    %169 = arith.addf %163, %168 : vector<2x8x8xf32>
    %c26 = arith.constant 26 : index
    %170 = memref.load %arg2[%c26] : memref<64xf32, #tpu.memory_space<smem>>
    %171 = vector.extract_strided_slice %7 {offsets = [0, 2, 0, 0], sizes = [2, 1, 8, 8], strides = [1, 1, 1, 1]} : vector<2x4x8x8xf32> to vector<2x1x8x8xf32>
    %172 = vector.shape_cast %171 : vector<2x1x8x8xf32> to vector<2x8x8xf32>
    %173 = vector.broadcast %170 : f32 to vector<2x8x8xf32>
    %174 = arith.mulf %173, %172 : vector<2x8x8xf32>
    %175 = arith.addf %169, %174 : vector<2x8x8xf32>
    %c30 = arith.constant 30 : index
    %176 = memref.load %arg2[%c30] : memref<64xf32, #tpu.memory_space<smem>>
    %177 = vector.extract_strided_slice %7 {offsets = [0, 3, 0, 0], sizes = [2, 1, 8, 8], strides = [1, 1, 1, 1]} : vector<2x4x8x8xf32> to vector<2x1x8x8xf32>
    %178 = vector.shape_cast %177 : vector<2x1x8x8xf32> to vector<2x8x8xf32>
    %179 = vector.broadcast %176 : f32 to vector<2x8x8xf32>
    %180 = arith.mulf %179, %178 : vector<2x8x8xf32>
    %181 = arith.addf %175, %180 : vector<2x8x8xf32>
    %c19 = arith.constant 19 : index
    %182 = memref.load %arg2[%c19] : memref<64xf32, #tpu.memory_space<smem>>
    %183 = vector.extract_strided_slice %8 {offsets = [0, 0, 0, 0], sizes = [2, 1, 8, 8], strides = [1, 1, 1, 1]} : vector<2x4x8x8xf32> to vector<2x1x8x8xf32>
    %184 = vector.shape_cast %183 : vector<2x1x8x8xf32> to vector<2x8x8xf32>
    %185 = vector.broadcast %182 : f32 to vector<2x8x8xf32>
    %186 = arith.mulf %185, %184 : vector<2x8x8xf32>
    %187 = arith.addf %181, %186 : vector<2x8x8xf32>
    %c23 = arith.constant 23 : index
    %188 = memref.load %arg2[%c23] : memref<64xf32, #tpu.memory_space<smem>>
    %189 = vector.extract_strided_slice %8 {offsets = [0, 1, 0, 0], sizes = [2, 1, 8, 8], strides = [1, 1, 1, 1]} : vector<2x4x8x8xf32> to vector<2x1x8x8xf32>
    %190 = vector.shape_cast %189 : vector<2x1x8x8xf32> to vector<2x8x8xf32>
    %191 = vector.broadcast %188 : f32 to vector<2x8x8xf32>
    %192 = arith.mulf %191, %190 : vector<2x8x8xf32>
    %193 = arith.addf %187, %192 : vector<2x8x8xf32>
    %c27 = arith.constant 27 : index
    %194 = memref.load %arg2[%c27] : memref<64xf32, #tpu.memory_space<smem>>
    %195 = vector.extract_strided_slice %8 {offsets = [0, 2, 0, 0], sizes = [2, 1, 8, 8], strides = [1, 1, 1, 1]} : vector<2x4x8x8xf32> to vector<2x1x8x8xf32>
    %196 = vector.shape_cast %195 : vector<2x1x8x8xf32> to vector<2x8x8xf32>
    %197 = vector.broadcast %194 : f32 to vector<2x8x8xf32>
    %198 = arith.mulf %197, %196 : vector<2x8x8xf32>
    %199 = arith.addf %193, %198 : vector<2x8x8xf32>
    %c31 = arith.constant 31 : index
    %200 = memref.load %arg2[%c31] : memref<64xf32, #tpu.memory_space<smem>>
    %201 = vector.extract_strided_slice %8 {offsets = [0, 3, 0, 0], sizes = [2, 1, 8, 8], strides = [1, 1, 1, 1]} : vector<2x4x8x8xf32> to vector<2x1x8x8xf32>
    %202 = vector.shape_cast %201 : vector<2x1x8x8xf32> to vector<2x8x8xf32>
    %203 = vector.broadcast %200 : f32 to vector<2x8x8xf32>
    %204 = arith.mulf %203, %202 : vector<2x8x8xf32>
    %205 = arith.addf %199, %204 : vector<2x8x8xf32>
    %c1_9 = arith.constant 1 : index
    %206 = memref.load %arg3[%c1_9] : memref<4xf32, #tpu.memory_space<smem>>
    %207 = vector.broadcast %206 : f32 to vector<2x8x8xf32>
    %208 = arith.addf %205, %207 : vector<2x8x8xf32>
    %cst_10 = arith.constant 0.000000e+00 : f32
    %209 = vector.broadcast %cst_10 : f32 to vector<2x8x8xf32>
    %c32 = arith.constant 32 : index
    %210 = memref.load %arg2[%c32] : memref<64xf32, #tpu.memory_space<smem>>
    %211 = vector.extract_strided_slice %5 {offsets = [0, 0, 0, 0], sizes = [2, 1, 8, 8], strides = [1, 1, 1, 1]} : vector<2x4x8x8xf32> to vector<2x1x8x8xf32>
    %212 = vector.shape_cast %211 : vector<2x1x8x8xf32> to vector<2x8x8xf32>
    %213 = vector.broadcast %210 : f32 to vector<2x8x8xf32>
    %214 = arith.mulf %213, %212 : vector<2x8x8xf32>
    %215 = arith.addf %209, %214 : vector<2x8x8xf32>
    %c36 = arith.constant 36 : index
    %216 = memref.load %arg2[%c36] : memref<64xf32, #tpu.memory_space<smem>>
    %217 = vector.extract_strided_slice %5 {offsets = [0, 1, 0, 0], sizes = [2, 1, 8, 8], strides = [1, 1, 1, 1]} : vector<2x4x8x8xf32> to vector<2x1x8x8xf32>
    %218 = vector.shape_cast %217 : vector<2x1x8x8xf32> to vector<2x8x8xf32>
    %219 = vector.broadcast %216 : f32 to vector<2x8x8xf32>
    %220 = arith.mulf %219, %218 : vector<2x8x8xf32>
    %221 = arith.addf %215, %220 : vector<2x8x8xf32>
    %c40 = arith.constant 40 : index
    %222 = memref.load %arg2[%c40] : memref<64xf32, #tpu.memory_space<smem>>
    %223 = vector.extract_strided_slice %5 {offsets = [0, 2, 0, 0], sizes = [2, 1, 8, 8], strides = [1, 1, 1, 1]} : vector<2x4x8x8xf32> to vector<2x1x8x8xf32>
    %224 = vector.shape_cast %223 : vector<2x1x8x8xf32> to vector<2x8x8xf32>
    %225 = vector.broadcast %222 : f32 to vector<2x8x8xf32>
    %226 = arith.mulf %225, %224 : vector<2x8x8xf32>
    %227 = arith.addf %221, %226 : vector<2x8x8xf32>
    %c44 = arith.constant 44 : index
    %228 = memref.load %arg2[%c44] : memref<64xf32, #tpu.memory_space<smem>>
    %229 = vector.extract_strided_slice %5 {offsets = [0, 3, 0, 0], sizes = [2, 1, 8, 8], strides = [1, 1, 1, 1]} : vector<2x4x8x8xf32> to vector<2x1x8x8xf32>
    %230 = vector.shape_cast %229 : vector<2x1x8x8xf32> to vector<2x8x8xf32>
    %231 = vector.broadcast %228 : f32 to vector<2x8x8xf32>
    %232 = arith.mulf %231, %230 : vector<2x8x8xf32>
    %233 = arith.addf %227, %232 : vector<2x8x8xf32>
    %c33 = arith.constant 33 : index
    %234 = memref.load %arg2[%c33] : memref<64xf32, #tpu.memory_space<smem>>
    %235 = vector.extract_strided_slice %6 {offsets = [0, 0, 0, 0], sizes = [2, 1, 8, 8], strides = [1, 1, 1, 1]} : vector<2x4x8x8xf32> to vector<2x1x8x8xf32>
    %236 = vector.shape_cast %235 : vector<2x1x8x8xf32> to vector<2x8x8xf32>
    %237 = vector.broadcast %234 : f32 to vector<2x8x8xf32>
    %238 = arith.mulf %237, %236 : vector<2x8x8xf32>
    %239 = arith.addf %233, %238 : vector<2x8x8xf32>
    %c37 = arith.constant 37 : index
    %240 = memref.load %arg2[%c37] : memref<64xf32, #tpu.memory_space<smem>>
    %241 = vector.extract_strided_slice %6 {offsets = [0, 1, 0, 0], sizes = [2, 1, 8, 8], strides = [1, 1, 1, 1]} : vector<2x4x8x8xf32> to vector<2x1x8x8xf32>
    %242 = vector.shape_cast %241 : vector<2x1x8x8xf32> to vector<2x8x8xf32>
    %243 = vector.broadcast %240 : f32 to vector<2x8x8xf32>
    %244 = arith.mulf %243, %242 : vector<2x8x8xf32>
    %245 = arith.addf %239, %244 : vector<2x8x8xf32>
    %c41 = arith.constant 41 : index
    %246 = memref.load %arg2[%c41] : memref<64xf32, #tpu.memory_space<smem>>
    %247 = vector.extract_strided_slice %6 {offsets = [0, 2, 0, 0], sizes = [2, 1, 8, 8], strides = [1, 1, 1, 1]} : vector<2x4x8x8xf32> to vector<2x1x8x8xf32>
    %248 = vector.shape_cast %247 : vector<2x1x8x8xf32> to vector<2x8x8xf32>
    %249 = vector.broadcast %246 : f32 to vector<2x8x8xf32>
    %250 = arith.mulf %249, %248 : vector<2x8x8xf32>
    %251 = arith.addf %245, %250 : vector<2x8x8xf32>
    %c45 = arith.constant 45 : index
    %252 = memref.load %arg2[%c45] : memref<64xf32, #tpu.memory_space<smem>>
    %253 = vector.extract_strided_slice %6 {offsets = [0, 3, 0, 0], sizes = [2, 1, 8, 8], strides = [1, 1, 1, 1]} : vector<2x4x8x8xf32> to vector<2x1x8x8xf32>
    %254 = vector.shape_cast %253 : vector<2x1x8x8xf32> to vector<2x8x8xf32>
    %255 = vector.broadcast %252 : f32 to vector<2x8x8xf32>
    %256 = arith.mulf %255, %254 : vector<2x8x8xf32>
    %257 = arith.addf %251, %256 : vector<2x8x8xf32>
    %c34 = arith.constant 34 : index
    %258 = memref.load %arg2[%c34] : memref<64xf32, #tpu.memory_space<smem>>
    %259 = vector.extract_strided_slice %7 {offsets = [0, 0, 0, 0], sizes = [2, 1, 8, 8], strides = [1, 1, 1, 1]} : vector<2x4x8x8xf32> to vector<2x1x8x8xf32>
    %260 = vector.shape_cast %259 : vector<2x1x8x8xf32> to vector<2x8x8xf32>
    %261 = vector.broadcast %258 : f32 to vector<2x8x8xf32>
    %262 = arith.mulf %261, %260 : vector<2x8x8xf32>
    %263 = arith.addf %257, %262 : vector<2x8x8xf32>
    %c38 = arith.constant 38 : index
    %264 = memref.load %arg2[%c38] : memref<64xf32, #tpu.memory_space<smem>>
    %265 = vector.extract_strided_slice %7 {offsets = [0, 1, 0, 0], sizes = [2, 1, 8, 8], strides = [1, 1, 1, 1]} : vector<2x4x8x8xf32> to vector<2x1x8x8xf32>
    %266 = vector.shape_cast %265 : vector<2x1x8x8xf32> to vector<2x8x8xf32>
    %267 = vector.broadcast %264 : f32 to vector<2x8x8xf32>
    %268 = arith.mulf %267, %266 : vector<2x8x8xf32>
    %269 = arith.addf %263, %268 : vector<2x8x8xf32>
    %c42 = arith.constant 42 : index
    %270 = memref.load %arg2[%c42] : memref<64xf32, #tpu.memory_space<smem>>
    %271 = vector.extract_strided_slice %7 {offsets = [0, 2, 0, 0], sizes = [2, 1, 8, 8], strides = [1, 1, 1, 1]} : vector<2x4x8x8xf32> to vector<2x1x8x8xf32>
    %272 = vector.shape_cast %271 : vector<2x1x8x8xf32> to vector<2x8x8xf32>
    %273 = vector.broadcast %270 : f32 to vector<2x8x8xf32>
    %274 = arith.mulf %273, %272 : vector<2x8x8xf32>
    %275 = arith.addf %269, %274 : vector<2x8x8xf32>
    %c46 = arith.constant 46 : index
    %276 = memref.load %arg2[%c46] : memref<64xf32, #tpu.memory_space<smem>>
    %277 = vector.extract_strided_slice %7 {offsets = [0, 3, 0, 0], sizes = [2, 1, 8, 8], strides = [1, 1, 1, 1]} : vector<2x4x8x8xf32> to vector<2x1x8x8xf32>
    %278 = vector.shape_cast %277 : vector<2x1x8x8xf32> to vector<2x8x8xf32>
    %279 = vector.broadcast %276 : f32 to vector<2x8x8xf32>
    %280 = arith.mulf %279, %278 : vector<2x8x8xf32>
    %281 = arith.addf %275, %280 : vector<2x8x8xf32>
    %c35 = arith.constant 35 : index
    %282 = memref.load %arg2[%c35] : memref<64xf32, #tpu.memory_space<smem>>
    %283 = vector.extract_strided_slice %8 {offsets = [0, 0, 0, 0], sizes = [2, 1, 8, 8], strides = [1, 1, 1, 1]} : vector<2x4x8x8xf32> to vector<2x1x8x8xf32>
    %284 = vector.shape_cast %283 : vector<2x1x8x8xf32> to vector<2x8x8xf32>
    %285 = vector.broadcast %282 : f32 to vector<2x8x8xf32>
    %286 = arith.mulf %285, %284 : vector<2x8x8xf32>
    %287 = arith.addf %281, %286 : vector<2x8x8xf32>
    %c39 = arith.constant 39 : index
    %288 = memref.load %arg2[%c39] : memref<64xf32, #tpu.memory_space<smem>>
    %289 = vector.extract_strided_slice %8 {offsets = [0, 1, 0, 0], sizes = [2, 1, 8, 8], strides = [1, 1, 1, 1]} : vector<2x4x8x8xf32> to vector<2x1x8x8xf32>
    %290 = vector.shape_cast %289 : vector<2x1x8x8xf32> to vector<2x8x8xf32>
    %291 = vector.broadcast %288 : f32 to vector<2x8x8xf32>
    %292 = arith.mulf %291, %290 : vector<2x8x8xf32>
    %293 = arith.addf %287, %292 : vector<2x8x8xf32>
    %c43 = arith.constant 43 : index
    %294 = memref.load %arg2[%c43] : memref<64xf32, #tpu.memory_space<smem>>
    %295 = vector.extract_strided_slice %8 {offsets = [0, 2, 0, 0], sizes = [2, 1, 8, 8], strides = [1, 1, 1, 1]} : vector<2x4x8x8xf32> to vector<2x1x8x8xf32>
    %296 = vector.shape_cast %295 : vector<2x1x8x8xf32> to vector<2x8x8xf32>
    %297 = vector.broadcast %294 : f32 to vector<2x8x8xf32>
    %298 = arith.mulf %297, %296 : vector<2x8x8xf32>
    %299 = arith.addf %293, %298 : vector<2x8x8xf32>
    %c47 = arith.constant 47 : index
    %300 = memref.load %arg2[%c47] : memref<64xf32, #tpu.memory_space<smem>>
    %301 = vector.extract_strided_slice %8 {offsets = [0, 3, 0, 0], sizes = [2, 1, 8, 8], strides = [1, 1, 1, 1]} : vector<2x4x8x8xf32> to vector<2x1x8x8xf32>
    %302 = vector.shape_cast %301 : vector<2x1x8x8xf32> to vector<2x8x8xf32>
    %303 = vector.broadcast %300 : f32 to vector<2x8x8xf32>
    %304 = arith.mulf %303, %302 : vector<2x8x8xf32>
    %305 = arith.addf %299, %304 : vector<2x8x8xf32>
    %c2_11 = arith.constant 2 : index
    %306 = memref.load %arg3[%c2_11] : memref<4xf32, #tpu.memory_space<smem>>
    %307 = vector.broadcast %306 : f32 to vector<2x8x8xf32>
    %308 = arith.addf %305, %307 : vector<2x8x8xf32>
    %cst_12 = arith.constant 0.000000e+00 : f32
    %309 = vector.broadcast %cst_12 : f32 to vector<2x8x8xf32>
    %c48 = arith.constant 48 : index
    %310 = memref.load %arg2[%c48] : memref<64xf32, #tpu.memory_space<smem>>
    %311 = vector.extract_strided_slice %5 {offsets = [0, 0, 0, 0], sizes = [2, 1, 8, 8], strides = [1, 1, 1, 1]} : vector<2x4x8x8xf32> to vector<2x1x8x8xf32>
    %312 = vector.shape_cast %311 : vector<2x1x8x8xf32> to vector<2x8x8xf32>
    %313 = vector.broadcast %310 : f32 to vector<2x8x8xf32>
    %314 = arith.mulf %313, %312 : vector<2x8x8xf32>
    %315 = arith.addf %309, %314 : vector<2x8x8xf32>
    %c52 = arith.constant 52 : index
    %316 = memref.load %arg2[%c52] : memref<64xf32, #tpu.memory_space<smem>>
    %317 = vector.extract_strided_slice %5 {offsets = [0, 1, 0, 0], sizes = [2, 1, 8, 8], strides = [1, 1, 1, 1]} : vector<2x4x8x8xf32> to vector<2x1x8x8xf32>
    %318 = vector.shape_cast %317 : vector<2x1x8x8xf32> to vector<2x8x8xf32>
    %319 = vector.broadcast %316 : f32 to vector<2x8x8xf32>
    %320 = arith.mulf %319, %318 : vector<2x8x8xf32>
    %321 = arith.addf %315, %320 : vector<2x8x8xf32>
    %c56 = arith.constant 56 : index
    %322 = memref.load %arg2[%c56] : memref<64xf32, #tpu.memory_space<smem>>
    %323 = vector.extract_strided_slice %5 {offsets = [0, 2, 0, 0], sizes = [2, 1, 8, 8], strides = [1, 1, 1, 1]} : vector<2x4x8x8xf32> to vector<2x1x8x8xf32>
    %324 = vector.shape_cast %323 : vector<2x1x8x8xf32> to vector<2x8x8xf32>
    %325 = vector.broadcast %322 : f32 to vector<2x8x8xf32>
    %326 = arith.mulf %325, %324 : vector<2x8x8xf32>
    %327 = arith.addf %321, %326 : vector<2x8x8xf32>
    %c60 = arith.constant 60 : index
    %328 = memref.load %arg2[%c60] : memref<64xf32, #tpu.memory_space<smem>>
    %329 = vector.extract_strided_slice %5 {offsets = [0, 3, 0, 0], sizes = [2, 1, 8, 8], strides = [1, 1, 1, 1]} : vector<2x4x8x8xf32> to vector<2x1x8x8xf32>
    %330 = vector.shape_cast %329 : vector<2x1x8x8xf32> to vector<2x8x8xf32>
    %331 = vector.broadcast %328 : f32 to vector<2x8x8xf32>
    %332 = arith.mulf %331, %330 : vector<2x8x8xf32>
    %333 = arith.addf %327, %332 : vector<2x8x8xf32>
    %c49 = arith.constant 49 : index
    %334 = memref.load %arg2[%c49] : memref<64xf32, #tpu.memory_space<smem>>
    %335 = vector.extract_strided_slice %6 {offsets = [0, 0, 0, 0], sizes = [2, 1, 8, 8], strides = [1, 1, 1, 1]} : vector<2x4x8x8xf32> to vector<2x1x8x8xf32>
    %336 = vector.shape_cast %335 : vector<2x1x8x8xf32> to vector<2x8x8xf32>
    %337 = vector.broadcast %334 : f32 to vector<2x8x8xf32>
    %338 = arith.mulf %337, %336 : vector<2x8x8xf32>
    %339 = arith.addf %333, %338 : vector<2x8x8xf32>
    %c53 = arith.constant 53 : index
    %340 = memref.load %arg2[%c53] : memref<64xf32, #tpu.memory_space<smem>>
    %341 = vector.extract_strided_slice %6 {offsets = [0, 1, 0, 0], sizes = [2, 1, 8, 8], strides = [1, 1, 1, 1]} : vector<2x4x8x8xf32> to vector<2x1x8x8xf32>
    %342 = vector.shape_cast %341 : vector<2x1x8x8xf32> to vector<2x8x8xf32>
    %343 = vector.broadcast %340 : f32 to vector<2x8x8xf32>
    %344 = arith.mulf %343, %342 : vector<2x8x8xf32>
    %345 = arith.addf %339, %344 : vector<2x8x8xf32>
    %c57 = arith.constant 57 : index
    %346 = memref.load %arg2[%c57] : memref<64xf32, #tpu.memory_space<smem>>
    %347 = vector.extract_strided_slice %6 {offsets = [0, 2, 0, 0], sizes = [2, 1, 8, 8], strides = [1, 1, 1, 1]} : vector<2x4x8x8xf32> to vector<2x1x8x8xf32>
    %348 = vector.shape_cast %347 : vector<2x1x8x8xf32> to vector<2x8x8xf32>
    %349 = vector.broadcast %346 : f32 to vector<2x8x8xf32>
    %350 = arith.mulf %349, %348 : vector<2x8x8xf32>
    %351 = arith.addf %345, %350 : vector<2x8x8xf32>
    %c61 = arith.constant 61 : index
    %352 = memref.load %arg2[%c61] : memref<64xf32, #tpu.memory_space<smem>>
    %353 = vector.extract_strided_slice %6 {offsets = [0, 3, 0, 0], sizes = [2, 1, 8, 8], strides = [1, 1, 1, 1]} : vector<2x4x8x8xf32> to vector<2x1x8x8xf32>
    %354 = vector.shape_cast %353 : vector<2x1x8x8xf32> to vector<2x8x8xf32>
    %355 = vector.broadcast %352 : f32 to vector<2x8x8xf32>
    %356 = arith.mulf %355, %354 : vector<2x8x8xf32>
    %357 = arith.addf %351, %356 : vector<2x8x8xf32>
    %c50 = arith.constant 50 : index
    %358 = memref.load %arg2[%c50] : memref<64xf32, #tpu.memory_space<smem>>
    %359 = vector.extract_strided_slice %7 {offsets = [0, 0, 0, 0], sizes = [2, 1, 8, 8], strides = [1, 1, 1, 1]} : vector<2x4x8x8xf32> to vector<2x1x8x8xf32>
    %360 = vector.shape_cast %359 : vector<2x1x8x8xf32> to vector<2x8x8xf32>
    %361 = vector.broadcast %358 : f32 to vector<2x8x8xf32>
    %362 = arith.mulf %361, %360 : vector<2x8x8xf32>
    %363 = arith.addf %357, %362 : vector<2x8x8xf32>
    %c54 = arith.constant 54 : index
    %364 = memref.load %arg2[%c54] : memref<64xf32, #tpu.memory_space<smem>>
    %365 = vector.extract_strided_slice %7 {offsets = [0, 1, 0, 0], sizes = [2, 1, 8, 8], strides = [1, 1, 1, 1]} : vector<2x4x8x8xf32> to vector<2x1x8x8xf32>
    %366 = vector.shape_cast %365 : vector<2x1x8x8xf32> to vector<2x8x8xf32>
    %367 = vector.broadcast %364 : f32 to vector<2x8x8xf32>
    %368 = arith.mulf %367, %366 : vector<2x8x8xf32>
    %369 = arith.addf %363, %368 : vector<2x8x8xf32>
    %c58 = arith.constant 58 : index
    %370 = memref.load %arg2[%c58] : memref<64xf32, #tpu.memory_space<smem>>
    %371 = vector.extract_strided_slice %7 {offsets = [0, 2, 0, 0], sizes = [2, 1, 8, 8], strides = [1, 1, 1, 1]} : vector<2x4x8x8xf32> to vector<2x1x8x8xf32>
    %372 = vector.shape_cast %371 : vector<2x1x8x8xf32> to vector<2x8x8xf32>
    %373 = vector.broadcast %370 : f32 to vector<2x8x8xf32>
    %374 = arith.mulf %373, %372 : vector<2x8x8xf32>
    %375 = arith.addf %369, %374 : vector<2x8x8xf32>
    %c62 = arith.constant 62 : index
    %376 = memref.load %arg2[%c62] : memref<64xf32, #tpu.memory_space<smem>>
    %377 = vector.extract_strided_slice %7 {offsets = [0, 3, 0, 0], sizes = [2, 1, 8, 8], strides = [1, 1, 1, 1]} : vector<2x4x8x8xf32> to vector<2x1x8x8xf32>
    %378 = vector.shape_cast %377 : vector<2x1x8x8xf32> to vector<2x8x8xf32>
    %379 = vector.broadcast %376 : f32 to vector<2x8x8xf32>
    %380 = arith.mulf %379, %378 : vector<2x8x8xf32>
    %381 = arith.addf %375, %380 : vector<2x8x8xf32>
    %c51 = arith.constant 51 : index
    %382 = memref.load %arg2[%c51] : memref<64xf32, #tpu.memory_space<smem>>
    %383 = vector.extract_strided_slice %8 {offsets = [0, 0, 0, 0], sizes = [2, 1, 8, 8], strides = [1, 1, 1, 1]} : vector<2x4x8x8xf32> to vector<2x1x8x8xf32>
    %384 = vector.shape_cast %383 : vector<2x1x8x8xf32> to vector<2x8x8xf32>
    %385 = vector.broadcast %382 : f32 to vector<2x8x8xf32>
    %386 = arith.mulf %385, %384 : vector<2x8x8xf32>
    %387 = arith.addf %381, %386 : vector<2x8x8xf32>
    %c55 = arith.constant 55 : index
    %388 = memref.load %arg2[%c55] : memref<64xf32, #tpu.memory_space<smem>>
    %389 = vector.extract_strided_slice %8 {offsets = [0, 1, 0, 0], sizes = [2, 1, 8, 8], strides = [1, 1, 1, 1]} : vector<2x4x8x8xf32> to vector<2x1x8x8xf32>
    %390 = vector.shape_cast %389 : vector<2x1x8x8xf32> to vector<2x8x8xf32>
    %391 = vector.broadcast %388 : f32 to vector<2x8x8xf32>
    %392 = arith.mulf %391, %390 : vector<2x8x8xf32>
    %393 = arith.addf %387, %392 : vector<2x8x8xf32>
    %c59 = arith.constant 59 : index
    %394 = memref.load %arg2[%c59] : memref<64xf32, #tpu.memory_space<smem>>
    %395 = vector.extract_strided_slice %8 {offsets = [0, 2, 0, 0], sizes = [2, 1, 8, 8], strides = [1, 1, 1, 1]} : vector<2x4x8x8xf32> to vector<2x1x8x8xf32>
    %396 = vector.shape_cast %395 : vector<2x1x8x8xf32> to vector<2x8x8xf32>
    %397 = vector.broadcast %394 : f32 to vector<2x8x8xf32>
    %398 = arith.mulf %397, %396 : vector<2x8x8xf32>
    %399 = arith.addf %393, %398 : vector<2x8x8xf32>
    %c63 = arith.constant 63 : index
    %400 = memref.load %arg2[%c63] : memref<64xf32, #tpu.memory_space<smem>>
    %401 = vector.extract_strided_slice %8 {offsets = [0, 3, 0, 0], sizes = [2, 1, 8, 8], strides = [1, 1, 1, 1]} : vector<2x4x8x8xf32> to vector<2x1x8x8xf32>
    %402 = vector.shape_cast %401 : vector<2x1x8x8xf32> to vector<2x8x8xf32>
    %403 = vector.broadcast %400 : f32 to vector<2x8x8xf32>
    %404 = arith.mulf %403, %402 : vector<2x8x8xf32>
    %405 = arith.addf %399, %404 : vector<2x8x8xf32>
    %c3_13 = arith.constant 3 : index
    %406 = memref.load %arg3[%c3_13] : memref<4xf32, #tpu.memory_space<smem>>
    %407 = vector.broadcast %406 : f32 to vector<2x8x8xf32>
    %408 = arith.addf %405, %407 : vector<2x8x8xf32>
    %409 = vector.shape_cast %108 : vector<2x8x8xf32> to vector<2x1x8x8xf32>
    %410 = vector.shape_cast %208 : vector<2x8x8xf32> to vector<2x1x8x8xf32>
    %411 = vector.shape_cast %308 : vector<2x8x8xf32> to vector<2x1x8x8xf32>
    %412 = vector.shape_cast %408 : vector<2x8x8xf32> to vector<2x1x8x8xf32>
    %413 = tpu.concatenate %409, %410, %411, %412 in 1 : vector<2x1x8x8xf32>, vector<2x1x8x8xf32>, vector<2x1x8x8xf32>, vector<2x1x8x8xf32> -> vector<2x4x8x8xf32>
    %c0_14 = arith.constant 0 : index
    %c0_15 = arith.constant 0 : index
    %c0_16 = arith.constant 0 : index
    %c0_17 = arith.constant 0 : index
    %414 = vector.load %arg6[%c0_14, %c0_15, %c0_16, %c0_17] : memref<2x4x8x8xf32, #tpu.memory_space<vmem>>, vector<2x4x8x8xf32>
    tpu.vector_store %arg6[%c0_14, %c0_15, %c0_16, %c0_17], %413 {strides = array<i32>} : memref<2x4x8x8xf32, #tpu.memory_space<vmem>>, vector<2x4x8x8xf32>,
    return
  }
  func.func @transform_0(%arg0: i32, %arg1: i32) -> i32 {
    %c0_i32 = arith.constant 0 : i32
    %c0_i32_0 = arith.constant 0 : i32
    return %c0_i32 : i32
  }
  func.func @transform_1(%arg0: i32, %arg1: i32) -> i32 {
    %c0_i32 = arith.constant 0 : i32
    %c0_i32_0 = arith.constant 0 : i32
    return %c0_i32 : i32
  }
  func.func @transform_2(%arg0: i32, %arg1: i32) -> (i32, i32) {
    %c0_i32 = arith.constant 0 : i32
    %c0_i32_0 = arith.constant 0 : i32
    %c0_i32_1 = arith.constant 0 : i32
    return %c0_i32, %c0_i32_0 : i32, i32
  }
  func.func @transform_3(%arg0: i32, %arg1: i32) -> (i32, i32, i32, i32) {
    %c0_i32 = arith.constant 0 : i32
    %c0_i32_0 = arith.constant 0 : i32
    %c0_i32_1 = arith.constant 0 : i32
    return %arg0, %c0_i32, %arg1, %c0_i32_0 : i32, i32, i32, i32
  }
  func.func @transform_4(%arg0: i32, %arg1: i32) -> (i32, i32, i32, i32) {
    %c0_i32 = arith.constant 0 : i32
    %c0_i32_0 = arith.constant 0 : i32
    %c0_i32_1 = arith.constant 0 : i32
    return %arg0, %c0_i32, %arg1, %c0_i32_0 : i32, i32, i32, i32
  }
}

</mosaic_0001>

<bundles_post_ra>
// kernel: tpu_custom_call.1
= control target key start
LH: loop header
LB: loop body
LE: loop exit
PB: predicated region body
PF: predicated region fallthrough
CT: control target
= control target key end

     0   :  { %9 = vsyncpa [#allocation5], 0  ;;  %s1911_s0 = inlined_call_operand.hbm [shape: f32[64], index: 0, kind: input, shape index: {}]   ;;  %s1912_s1 = inlined_call_operand.vmem [shape: f32[4], index: 1, kind: input, shape index: {}]   ;;  %s1913_s2 = inlined_call_operand.hbm [shape: f32[32,32], index: 2, kind: input, shape index: {}]   ;;  %s1914_s3 = inlined_call_operand.hbm [shape: f32[2,4,8,32], index: 3, kind: input, shape index: {}]   ;;  %s1915_s4 = inlined_call_operand.hbm [shape: f32[2,4,8,8], index: 4, kind: output, shape index: {}]  }
   0x1   :  { %10 = vsyncpa [#allocation6], 0 }
   0x2   :  { %11 = vsyncpa [#allocation3], 0 }
   0x3   :  { %12 = vsyncpa [#allocation10], 0 }
   0x4   :  { %13 = vsyncpa [#allocation4], 0  ;;  %s28_s17 = sshll.u32 %s1912_s1, 4  ;;  %s1152_s20 = scalar_lea.hbm %s1911_s0, 16  ;;  %s29_s17 = int_to_ptr.vmem [resolvable:$true] %s28_s17 }
   0x5   :  { %p1153_p0 = scmp.ne.s32.totalorder %s1911_s0, %s1152_s20  ;;  %p1156_p1 = scmp.lt.u32.totalorder %s1152_s20, %s1911_s0 }
   0x7   :  { %p1158_p2 = pnand %p1156_p1, %p1153_p0 }
   0x9   :  { %1161 = shalt.err (!%p1158_p2)
}
   0xa   :  { %s1250_s25 = smov [#allocation2]   ;;  %s1162_s1 = scalar_lea.vmem %s29_s17, 16 }
   0xb   :  { %21 = dma.hbm_to_smem %s1911_s0, 16, %s1250_s25, [#allocation5]  }
   0xc   :  { %p1163_p3 = scmp.ne.s32.totalorder %s29_s17, %s1162_s1  ;;  %p1167_p4 = scmp.lt.s32.totalorder %s29_s17, %s29_s17 }
   0xd   :  { %p1168_p5 = scmp.lt.s32.totalorder %s1162_s1, %s1162_s1 }
   0xf   :  { %p1169_p6 = por %p1168_p5, %p1167_p4 }
  0x11   :  { %p1170_p7 = pnand %p1169_p6, %p1163_p3 }
  0x13   :  { %1173 = shalt.err (!%p1170_p7)
}
  0x14   :  { %s1251_s28 = smov [#allocation7]   ;;  %s1252_s29 = smov [#allocation8]  }
  0x15   :  { %31 = dma.vmem_to_smem %s29_s17, 16, %s1251_s28, [#allocation6]  }
  0x16   :  { %s37_s30 = sshll.u32 %s1252_s29, 4  ;;  %s1174_s7 = scalar_lea.hbm %s1913_s2, 512  ;;  %s38_s30 = int_to_ptr.vmem [resolvable:$true] %s37_s30 }
  0x17   :  { %p1175_p8 = scmp.ne.s32.totalorder %s1913_s2, %s1174_s7  ;;  %p1178_p9 = scmp.lt.u32.totalorder %s1174_s7, %s1913_s2 }
  0x19   :  { %p1180_p10 = pnand %p1178_p9, %p1175_p8 }
  0x1b   :  { %1183 = shalt.err (!%p1180_p10)
}
  0x1c   :  { %s1184_s11 = scalar_lea.vmem %s38_s30, 512  ;;  %p1189_p12 = scmp.lt.s32.totalorder %s38_s30, %s38_s30 }
  0x1d   :  { %p1185_p11 = scmp.ne.s32.totalorder %s38_s30, %s1184_s11  ;;  %p1190_p13 = scmp.lt.s32.totalorder %s1184_s11, %s1184_s11 }
  0x1f   :  { %p1191_p0 = por %p1190_p13, %p1189_p12 }
  0x21   :  { %p1192_p1 = pnand %p1191_p0, %p1185_p11 }
  0x23   :  { %1195 = shalt.err (!%p1192_p1)
}
  0x24   :  { %s1253_s12 = smov 128   ;;  %s1254_s13 = smov 8  }
  0x25   :  { %43 = dma.hbm_to_vmem [thread:$0]  %s1913_s2, 512, %s38_s30, [#allocation3], %s1253_s12, %s1253_s12, %s1254_s13  }
  0x26   :  { %s1255_s16 = smov [#allocation9]   ;;  %s1196_s20 = scalar_lea.hbm %s1914_s3, 1024 }
  0x27   :  { %s49_s17 = sshll.u32 %s1255_s16, 4  ;;  %p1197_p2 = scmp.ne.s32.totalorder %s1914_s3, %s1196_s20  ;;  %s50_s17 = int_to_ptr.vmem [resolvable:$true] %s49_s17 }
  0x28   :  { %p1200_p3 = scmp.lt.u32.totalorder %s1196_s20, %s1914_s3 }
  0x2a   :  { %p1202_p4 = pnand %p1200_p3, %p1197_p2 }
  0x2c   :  { %1205 = shalt.err (!%p1202_p4)
}
  0x2d   :  { %s1206_s25 = scalar_lea.vmem %s50_s17, 1024  ;;  %p1211_p6 = scmp.lt.s32.totalorder %s50_s17, %s50_s17 }
  0x2e   :  { %p1207_p5 = scmp.ne.s32.totalorder %s50_s17, %s1206_s25  ;;  %p1212_p7 = scmp.lt.s32.totalorder %s1206_s25, %s1206_s25 }
  0x30   :  { %p1213_p8 = por %p1212_p7, %p1211_p6 }
  0x32   :  { %p1214_p9 = pnand %p1213_p8, %p1207_p5 }
  0x34   :  { %1217 = shalt.err (!%p1214_p9)
}
  0x35   :  { %55 = dma.hbm_to_vmem [thread:$0]  %s1914_s3, 1024, %s50_s17, [#allocation10], %s1253_s12, %s1253_s12, %s1254_s13  }
  0x36   :  { %1240 = dma.done.wait [#allocation5], 16  }
  0x37   :  { %1241 = vsyncadd [#allocation5], 4294967280 }
  0x38   :  { %1242 = dma.done.wait [#allocation6], 16  }
  0x39   :  { %1243 = vsyncadd [#allocation6], 4294967280 }
  0x3a   :  { %1244 = dma.done.wait [#allocation3], 512  }
  0x3b   :  { %1245 = vsyncadd [#allocation3], 4294966784 }
  0x3c   :  { %1246 = dma.done.wait [#allocation10], 1024  }
  0x3d   :  { %1247 = vsyncadd [#allocation10], 4294966272 }
  0x3e   :  { %68 = sfence }
  0x3f   :  { %v69_v0 = vld [vmem:[#allocation8] sm:$0xff]  ;;  %v70_v1 = vld [vmem:[#allocation8 + $0x8] sm:$0xff]  ;;  %v71_v2 = vld [vmem:[#allocation8 + $0x10] sm:$0xff]  ;;  %vm81_vm0 = vcmask 261120   ;;  %s1040_s3 = sld [smem:[#allocation2 + $0x6]]  ;;  %s1036_s27 = sld [smem:[#allocation2 + $0x5]] }
  0x40   :  { %v1130_v3 = vpack.c.bf16 %v70_v1, %v69_v0  ;;  %v72_v4 = vld [vmem:[#allocation8 + $0x18] sm:$0xff]  ;;  %v73_v5 = vld [vmem:[#allocation9] sm:$0xff]  ;;  %v74_v8 = vld [vmem:[#allocation9 + $0x8] sm:$0xff]  ;;  %s1338_s1 = sld [smem:[#allocation2 + $0x7]]  ;;  %s1340_s28 = sld [smem:[#allocation2 + $0x15]]  ;;  %vm995_vm1 = vcmask 64512  }
  0x41   :  { %v1134_v6 = vpack.c.bf16 %v72_v4, %v71_v2  ;;  %1118 = vmatprep.mubr.msk.f32.mxu0 %vm81_vm0, %v73_v5  ;;  %v77_v7 = vld [vmem:[#allocation9 + $0x20] sm:$0xff]  ;;  %v78_v9 = vld [vmem:[#allocation9 + $0x28] sm:$0xff]  ;;  %v75_v10 = vld [vmem:[#allocation9 + $0x10] sm:$0xff]  ;;  %s1353_s29 = sld [smem:[#allocation2 + $0x16]]  ;;  %s1256_s30 = smov 112  }
  0x42   :  { %1131 = vmatprep.subr.bf16.mxu0 %v1130_v3  ;;  %1138 = vmatprep.subr.bf16.mxu1 %v1130_v3  ;;  %v79_v11 = vld [vmem:[#allocation9 + $0x30] sm:$0xff]  ;;  %v76_v12 = vld [vmem:[#allocation9 + $0x18] sm:$0xff]  ;;  %s1257_s5 = smov 120   ;;  %s1368_s6 = sld [smem:[#allocation2 + $0x17]] }
  0x43   :  { %1133 = vmatpush3.bf16.msra.mxu0 %v1130_v3  ;;  %1140 = vmatpush3.bf16.msra.mxu1 %v1130_v3  ;;  %v80_v13 = vld [vmem:[#allocation9 + $0x38] sm:$0xff]  ;;  %s1258_s7 = smov 104   ;;  %s1374_s8 = sld [smem:[#allocation2 + $0x25]] }
  0x44   :  { %1135 = vmatprep.subr.bf16.mxu0 %v1134_v6  ;;  %1139 = vmatprep.subr.bf16.mxu1 %v1134_v6  ;;  %s1377_s9 = sld [smem:[#allocation2 + $0x35]]  ;;  %s1379_s0 = sld [smem:[#allocation2]] }
  0x45   :  { %1124 = vmatprep.mubr.msk.f32.mxu1 %vm81_vm0, %v77_v7  ;;  %v306_v14 = vstv %s1040_s3  ;;  %v250_v15 = vstv %s1036_s27  ;;  %s1383_s10 = sld [smem:[#allocation2 + $0x4]]  ;;  %s1385_s11 = sld [smem:[#allocation2 + $0x8]] }
  0x46   :  { %v362_v22 = vstv %s1338_s1  ;;  %v446_v29 = vstv %s1340_s28  ;;  %s1387_s14 = sld [smem:[#allocation2 + $0x26]]  ;;  %s1389_s15 = sld [smem:[#allocation2 + $0xc]] }
  0x47   :  { %1137 = vmatpush3.bf16.msra.mxu0 %v1134_v6  ;;  %1141 = vmatpush3.bf16.msra.mxu1 %v1134_v6  ;;  %v502_v32 = vstv %s1353_s29  ;;  %s1393_s16 = sld [smem:[#allocation2 + $0x36]]  ;;  %s1395_s17 = sld [smem:[#allocation2 + $0x27]] }
  0x48   :  { %v558_v35 = vstv %s1368_s6  ;;  %s1398_s18 = sld [smem:[#allocation2 + $0x37]]  ;;  %s1402_s19 = sld [smem:[#allocation2 + $0x10]] }
  0x49   :  { %s1404_s20 = sld [smem:[#allocation2 + $0x14]]  ;;  %s1408_s21 = sld [smem:[#allocation2 + $0x18]]  ;;  %v642_v38 = vstv %s1374_s8 }
  0x4a   :  { %1119 = vmatmul.mubr.msk.f32.vlgmr.msra.gmra.mrb[0].mxu0 %vm81_vm0, %v74_v8  ;;  %1125 = vmatmul.mubr.msk.f32.vlgmr.msra.gmra.mrb[0].mxu1 %vm81_vm0, %v78_v9  ;;  %s1410_s22 = sld [smem:[#allocation2 + $0x1c]]  ;;  %v212_v39 = vstv %s1379_s0  ;;  %v838_v42 = vstv %s1377_s9  ;;  %s1427_s24 = sld [smem:[#allocation2 + $0x20]] }
  0x4b   :  { %1121 = vmatprep.mubr.msk.f32.mxu0 %vm81_vm0, %v75_v10  ;;  %1127 = vmatprep.mubr.msk.f32.mxu1 %vm81_vm0, %v79_v11  ;;  %v218_v40 = vstv %s1383_s10  ;;  %v224_v41 = vstv %s1385_s11  ;;  %s1418_s23 = sld [smem:[#allocation2 + $0x24]]  ;;  %s1433_s25 = sld [smem:[#allocation2 + $0x28]] }
  0x4c   :  { %v698_v43 = vstv %s1387_s14  ;;  %v230_v44 = vstv %s1389_s15  ;;  %s1435_s2 = sld [smem:[#allocation2 + $0x34]]  ;;  %s1442_s26 = sld [smem:[#allocation2 + $0x30]] }
  0x4d   :  { %v894_v47 = vstv %s1393_s16  ;;  %v754_v48 = vstv %s1395_s17  ;;  %s1447_s3 = sld [smem:[#allocation2 + $0x2c]]  ;;  %s1457_s27 = sld [smem:[#allocation2 + $0x38]] }
  0x4e   :  { %1122 = vmatmul.mubr.msk.f32.gmra.mrb[2].mxu0 %vm81_vm0, %v76_v12  ;;  %1128 = vmatmul.mubr.msk.f32.gmra.mrb[2].mxu1 %vm81_vm0, %v80_v13  ;;  %v950_v49 = vstv %s1398_s18  ;;  %v408_v54 = vstv %s1402_s19  ;;  %s1465_s1 = sld [smem:[#allocation2 + $0x3c]]  ;;  %s1493_s28 = sld [smem:[#allocation2 + $0x1]] }
  0x4f   :  { %v414_v55 = vstv %s1404_s20  ;;  %v420_v62 = vstv %s1408_s21  ;;  %s1039_s29 = sld [smem:[#allocation2 + $0x2]]  ;;  %s1043_s6 = sld [smem:[#allocation2 + $0x3]] }
  0x50   :  { %v426_v63 = vstv %s1410_s22  ;;  %s1051_s8 = sld [smem:[#allocation2 + $0x11]]  ;;  %s1055_s9 = sld [smem:[#allocation2 + $0x12]] }
  0x51   :  { %v610_v7 = vstv %s1418_s23  ;;  %s1059_s0 = sld [smem:[#allocation2 + $0x13]]  ;;  %s1068_s10 = sld [smem:[#allocation2 + $0x21]] }
  0x52   :  { %s1085_s11 = sld [smem:[#allocation2 + $0x31]]  ;;  %s1072_s14 = sld [smem:[#allocation2 + $0x22]] }
  0x53   :  { %s1089_s15 = sld [smem:[#allocation2 + $0x32]]  ;;  %s1076_s16 = sld [smem:[#allocation2 + $0x23]] }
  0x54   :  { %s1093_s17 = sld [smem:[#allocation2 + $0x33]]  ;;  %s1038_s18 = sld [smem:[#allocation2 + $0xd]] }
  0x55   :  { %s1042_s19 = sld [smem:[#allocation2 + $0xe]]  ;;  %s1046_s20 = sld [smem:[#allocation2 + $0xf]] }
  0x56   :  { %s1054_s21 = sld [smem:[#allocation2 + $0x1d]]  ;;  %s1058_s22 = sld [smem:[#allocation2 + $0x1e]] }
  0x57   :  { %s1062_s23 = sld [smem:[#allocation2 + $0x1f]] }
 0x11d   :  { %v1342_v16 = vpop.f32.mrb[0].mxu0  ;;  %v1344_v17 = vpop.f32.mrb[0].mxu1 }
 0x11e   :  { %v1346_v18 = vpop.f32.mrb[1].mxu0  ;;  %v307_v19 = vmul.f32 %v1342_v16, %v306_v14  ;;  %v251_v20 = vmul.f32 %v1342_v16, %v250_v15  ;;  %v1350_v21 = vpop.f32.mrb[1].mxu1  ;;  %v252_v23 = vmul.f32 %v1344_v17, %v250_v15  ;;  %v363_v28 = vmul.f32 %v1342_v16, %v362_v22 }
 0x11f   :  { %v308_v30 = vmul.f32 %v1344_v17, %v306_v14  ;;  %v447_v31 = vmul.f32 %v1342_v16, %v446_v29  ;;  %v503_v33 = vmul.f32 %v1342_v16, %v502_v32  ;;  %v364_v34 = vmul.f32 %v1344_v17, %v362_v22 }
 0x120   :  { %311 = vrot.lane.b32.xlu0 %v307_v19, %s1256_s30  ;;  %255 = vrot.lane.b32.xlu1 %v251_v20, %s1257_s5  ;;  %v559_v36 = vmul.f32 %v1342_v16, %v558_v35  ;;  %v448_v37 = vmul.f32 %v1344_v17, %v446_v29  ;;  %v643_v45 = vmul.f32 %v1342_v16, %v642_v38  ;;  %v604_v20 = vstv %s1427_s24  ;;  %s1071_s24 = sld [smem:[#allocation2 + $0x2d]] }
 0x121   :  { %v1358_v24 = vpop.f32.mrb[2].mxu0  ;;  %v1360_v25 = vpop.f32.mrb[2].mxu1  ;;  %v504_v46 = vmul.f32 %v1344_v17, %v502_v32  ;;  %v219_v50 = vmul.f32 %v1342_v16, %v218_v40  ;;  %v213_v51 = vmul.f32 %v212_v39, %v1346_v18  ;;  %v214_v57 = vmul.f32 %v212_v39, %v1350_v21 }
 0x122   :  { %v1362_v26 = vpop.f32.mrb[3].mxu0  ;;  %v1364_v27 = vpop.f32.mrb[3].mxu1  ;;  %v231_v53 = vmul.f32 %v1358_v24, %v230_v44  ;;  %v220_v58 = vmul.f32 %v1344_v17, %v218_v40  ;;  %v839_v60 = vmul.f32 %v1342_v16, %v838_v42  ;;  %v560_v61 = vmul.f32 %v1344_v17, %v558_v35 }
 0x123   :  { %v225_v52 = vmul.f32 %v224_v41, %v1362_v26  ;;  %v221_v56 = vadd.f32 %v219_v50, %v213_v51  ;;  %v226_v59 = vmul.f32 %v224_v41, %v1364_v27  ;;  %v699_v0 = vmul.f32 %v1342_v16, %v698_v43 }
 0x124   :  { %367 = vrot.lane.b32.xlu0 %v363_v28, %s1258_s7  ;;  %257 = vrot.lane.b32.xlu1 %v252_v23, %s1257_s5  ;;  %v222_v2 = vadd.f32 %v220_v58, %v214_v57  ;;  %v232_v3 = vmul.f32 %v1360_v25, %v230_v44  ;;  %v644_v4 = vmul.f32 %v1344_v17, %v642_v38  ;;  %v616_v22 = vstv %s1433_s25  ;;  %s1088_s25 = sld [smem:[#allocation2 + $0x3d]] }
 0x125   :  { %v227_v1 = vadd.f32 %v225_v52, %v221_v56  ;;  %v410_v5 = vmul.f32 %v408_v54, %v1350_v21  ;;  %v416_v6 = vmul.f32 %v1344_v17, %v414_v55  ;;  %v422_v10 = vmul.f32 %v420_v62, %v1364_v27 }
 0x126   :  { %v228_v9 = vadd.f32 %v226_v59, %v222_v2  ;;  %v428_v11 = vmul.f32 %v1360_v25, %v426_v63  ;;  %v409_v13 = vmul.f32 %v408_v54, %v1346_v18  ;;  %v415_v14 = vmul.f32 %v1342_v16, %v414_v55 }
 0x127   :  { %v1467_v8 = vadd.f32 %v231_v53, %v227_v1  ;;  %v418_v12 = vadd.f32 %v416_v6, %v410_v5  ;;  %v421_v15 = vmul.f32 %v420_v62, %v1362_v26  ;;  %v806_v23 = vstv %s1435_s2  ;;  %s1075_s2 = sld [smem:[#allocation2 + $0x2e]] }
 0x128   :  { %451 = vrot.lane.b32.xlu0 %v447_v31, %s1257_s5  ;;  %313 = vrot.lane.b32.xlu1 %v308_v30, %s1256_s30  ;;  %v1474_v19 = vadd.f32 %v232_v3, %v228_v9  ;;  %v417_v29 = vadd.f32 %v415_v14, %v409_v13  ;;  %v427_v30 = vmul.f32 %v1358_v24, %v426_v63  ;;  %v800_v31 = vstv %s1442_s26  ;;  %s1092_s26 = sld [smem:[#allocation2 + $0x3e]] }
 0x129   :  { %v424_v28 = vadd.f32 %v422_v10, %v418_v12  ;;  %v895_v32 = vmul.f32 %v1342_v16, %v894_v47  ;;  %v622_v35 = vstv %s1447_s3  ;;  %v612_v38 = vmul.f32 %v1344_v17, %v610_v7  ;;  %s1079_s3 = sld [smem:[#allocation2 + $0x2f]] }
 0x12a   :  { %v618_v39 = vmul.f32 %v616_v22, %v1364_v27  ;;  %v605_v40 = vmul.f32 %v604_v20, %v1346_v18  ;;  %v611_v41 = vmul.f32 %v1342_v16, %v610_v7  ;;  %v812_v44 = vstv %s1457_s27  ;;  %s1037_s27 = sld [smem:[#allocation2 + $0x9]] }
 0x12b   :  { %v624_v50 = vmul.f32 %v1360_v25, %v622_v35  ;;  %v818_v51 = vstv %s1465_s1  ;;  %v755_v52 = vmul.f32 %v1342_v16, %v754_v48  ;;  %v623_v54 = vmul.f32 %v1358_v24, %v622_v35  ;;  %s1041_s1 = sld [smem:[#allocation2 + $0xa]] }
 0x12c   :  { %507 = vrot.lane.b32.xlu0 %v503_v33, %s1256_s30  ;;  %369 = vrot.lane.b32.xlu1 %v364_v34, %s1258_s7  ;;  %v840_v33 = vmul.f32 %v1344_v17, %v838_v42  ;;  %v606_v34 = vmul.f32 %v604_v20, %v1350_v21  ;;  %v617_v42 = vmul.f32 %v616_v22, %v1362_v26  ;;  %v236_v9 = vstv %s1493_s28  ;;  %s1045_s28 = sld [smem:[#allocation2 + $0xb]] }
 0x12d   :  { %v613_v53 = vadd.f32 %v611_v41, %v605_v40  ;;  %v802_v55 = vmul.f32 %v800_v31, %v1350_v21  ;;  %v700_v56 = vmul.f32 %v1344_v17, %v698_v43  ;;  %v808_v58 = vmul.f32 %v1344_v17, %v806_v23 }
 0x12e   :  { %v814_v59 = vmul.f32 %v812_v44, %v1364_v27  ;;  %v807_v62 = vmul.f32 %v1342_v16, %v806_v23  ;;  %v813_v63 = vmul.f32 %v812_v44, %v1362_v26  ;;  %v820_v1 = vmul.f32 %v1360_v25, %v818_v51 }
 0x12f   :  { %v951_v5 = vmul.f32 %v1342_v16, %v950_v49  ;;  %v896_v6 = vmul.f32 %v1344_v17, %v894_v47  ;;  %v756_v13 = vmul.f32 %v1344_v17, %v754_v48  ;;  %v237_v16 = vmul.f32 %v236_v9, %v1346_v18 }
 0x130   :  { %563 = vrot.lane.b32.xlu0 %v559_v36, %s1258_s7  ;;  %453 = vrot.lane.b32.xlu1 %v448_v37, %s1257_s5  ;;  %v1489_v36 = vadd.f32 %v428_v11, %v424_v28  ;;  %v423_v37 = vadd.f32 %v421_v15, %v417_v29  ;;  %v952_v47 = vmul.f32 %v1344_v17, %v950_v49  ;;  %v292_v15 = vstv %s1039_s29  ;;  %s1053_s29 = sld [smem:[#allocation2 + $0x19]] }
 0x131   :  { %v238_v14 = vmul.f32 %v236_v9, %v1350_v21  ;;  %v294_v48 = vmul.f32 %v292_v15, %v1350_v21  ;;  %v293_v20 = vmul.f32 %v292_v15, %v1346_v18  ;;  %v348_v22 = vstv %s1043_s6  ;;  %s1057_s6 = sld [smem:[#allocation2 + $0x1a]] }
 0x132   :  { %v350_v17 = vmul.f32 %v348_v22, %v1350_v21  ;;  %v349_v49 = vmul.f32 %v348_v22, %v1346_v18  ;;  %v432_v23 = vstv %s1051_s8  ;;  %v824_v40 = vstv %s1085_s11  ;;  %s1061_s8 = sld [smem:[#allocation2 + $0x1b]]  ;;  %s1091_s11 = sld [smem:[#allocation2 + $0x3a]] }
 0x133   :  { %v434_v28 = vmul.f32 %v432_v23, %v1350_v21  ;;  %v433_v29 = vmul.f32 %v432_v23, %v1346_v18  ;;  %v826_v41 = vmul.f32 %v824_v40, %v1350_v21  ;;  %v684_v44 = vstv %s1072_s14  ;;  %s1078_s14 = sld [smem:[#allocation2 + $0x2b]] }
 0x134   :  { %647 = vrot.lane.b32.xlu0 %v643_v45, %s1257_s5  ;;  %509 = vrot.lane.b32.xlu1 %v504_v46, %s1256_s30  ;;  %v1501_v45 = vadd.f32 %v427_v30, %v423_v37  ;;  %v614_v46 = vadd.f32 %v612_v38, %v606_v34  ;;  %v488_v30 = vstv %s1055_s9  ;;  %v628_v37 = vstv %s1068_s10  ;;  %s1070_s9 = sld [smem:[#allocation2 + $0x29]]  ;;  %s1074_s10 = sld [smem:[#allocation2 + $0x2a]] }
 0x135   :  { %v630_v38 = vmul.f32 %v628_v37, %v1350_v21  ;;  %v866_v23 = vstv %s1088_s25 }
 0x136   :  { %v620_v57 = vadd.f32 %v618_v39, %v614_v46  ;;  %v629_v39 = vmul.f32 %v628_v37, %v1346_v18  ;;  %v686_v46 = vmul.f32 %v684_v44, %v1350_v21 }
 0x138   :  { %843 = vrot.lane.b32.xlu0 %v839_v60, %s1257_s5  ;;  %565 = vrot.lane.b32.xlu1 %v560_v61, %s1258_s7  ;;  %v619_v60 = vadd.f32 %v617_v42, %v613_v53  ;;  %v801_v61 = vmul.f32 %v800_v31, %v1346_v18  ;;  %v1520_v43 = vadd.f32 %v624_v50, %v620_v57  ;;  %v936_v57 = vstv %s1093_s17  ;;  %s1097_s17 = sld [smem:[#allocation7 + $0x3]] }
 0x139   :  { %v490_v31 = vmul.f32 %v488_v30, %v1350_v21  ;;  %v825_v42 = vmul.f32 %v824_v40, %v1346_v18  ;;  %v685_v50 = vmul.f32 %v684_v44, %v1346_v18  ;;  %v782_v44 = vstv %s1079_s3 }
 0x13a   :  { %v1523_v2 = vadd.f32 %v623_v54, %v619_v60  ;;  %v809_v3 = vadd.f32 %v807_v62, %v801_v61  ;;  %v740_v54 = vstv %s1076_s16  ;;  %v937_v60 = vmul.f32 %v936_v57, %v1346_v18  ;;  %s1080_s16 = sld [smem:[#allocation7 + $0x2]] }
 0x13c   :  { %703 = vrot.lane.b32.xlu0 %v699_v0, %s1256_s30  ;;  %649 = vrot.lane.b32.xlu1 %v644_v4, %s1257_s5  ;;  %v810_v0 = vadd.f32 %v808_v58, %v802_v55  ;;  %v819_v4 = vmul.f32 %v1358_v24, %v818_v51  ;;  %v815_v10 = vadd.f32 %v813_v63, %v809_v3  ;;  %v880_v51 = vstv %s1089_s15  ;;  %s1095_s15 = sld [smem:[#allocation2 + $0x3b]] }
 0x13d   :  { %v881_v53 = vmul.f32 %v880_v51, %v1346_v18  ;;  %v742_v55 = vmul.f32 %v740_v54, %v1350_v21  ;;  %v278_v58 = vstv %s1038_s18  ;;  %v334_v63 = vstv %s1042_s19  ;;  %s1259_s18 = smov [#allocation11]  }
 0x13e   :  { %v816_v7 = vadd.f32 %v814_v59, %v810_v0  ;;  %v1537_v12 = vadd.f32 %v819_v4, %v815_v10  ;;  %v938_v59 = vmul.f32 %v936_v57, %v1350_v21  ;;  %v280_v61 = vmul.f32 %v1360_v25, %v278_v58  ;;  %s1009_s19 = sshll.u32 %s1259_s18, 4  ;;  %s1010_s19 = int_to_ptr.vmem [resolvable:$true] %s1009_s19 }
 0x13f   :  { %v279_v62 = vmul.f32 %v1358_v24, %v278_v58  ;;  %v336_v0 = vmul.f32 %v1360_v25, %v334_v63  ;;  %v474_v4 = vstv %s1054_s21  ;;  %v320_v58 = vstv %s1041_s1  ;;  %p1223_p11 = scmp.lt.s32.totalorder %s1010_s19, %s1010_s19 }
 0x140   :  { %899 = vrot.lane.b32.xlu0 %v895_v32, %s1256_s30  ;;  %845 = vrot.lane.b32.xlu1 %v840_v33, %s1257_s5  ;;  %v1535_v11 = vadd.f32 %v820_v1, %v816_v7  ;;  %v489_v32 = vmul.f32 %v488_v30, %v1346_v18  ;;  %v544_v33 = vstv %s1059_s0  ;;  %v530_v7 = vstv %s1058_s22  ;;  %s1087_s0 = sld [smem:[#allocation2 + $0x39]] }
 0x141   :  { %v546_v34 = vmul.f32 %v544_v33, %v1350_v21  ;;  %v545_v35 = vmul.f32 %v544_v33, %v1346_v18  ;;  %v532_v9 = vmul.f32 %v1360_v25, %v530_v7  ;;  %v531_v10 = vmul.f32 %v1358_v24, %v530_v7 }
 0x142   :  { %v868_v30 = vmul.f32 %v1360_v25, %v866_v23 }
 0x144   :  { %759 = vrot.lane.b32.xlu0 %v755_v52, %s1258_s7  ;;  %705 = vrot.lane.b32.xlu1 %v700_v56, %s1256_s30  ;;  %v882_v52 = vmul.f32 %v880_v51, %v1350_v21  ;;  %v741_v56 = vmul.f32 %v740_v54, %v1346_v18  ;;  %v335_v21 = vmul.f32 %v1358_v24, %v334_v63  ;;  %v390_v18 = vstv %s1046_s20  ;;  %s1218_s20 = scalar_lea.vmem %s1010_s19, 1024 }
 0x145   :  { %v392_v1 = vmul.f32 %v1360_v25, %v390_v18  ;;  %v391_v3 = vmul.f32 %v1358_v24, %v390_v18  ;;  %v784_v51 = vmul.f32 %v1360_v25, %v782_v44  ;;  %v376_v63 = vstv %s1045_s28  ;;  %p1219_p10 = scmp.ne.s32.totalorder %s1010_s19, %s1218_s20  ;;  %p1224_p12 = scmp.lt.s32.totalorder %s1218_s20, %s1218_s20 }
 0x146   :  { %v378_v18 = vmul.f32 %v376_v63, %v1364_v27 }
 0x147   :  { %p1225_p13 = por %p1224_p12, %p1223_p11 }
 0x148   :  { %955 = vrot.lane.b32.xlu0 %v951_v5, %s1258_s7  ;;  %901 = vrot.lane.b32.xlu1 %v896_v6, %s1256_s30  ;;  %v476_v5 = vmul.f32 %v1360_v25, %v474_v4  ;;  %v475_v6 = vmul.f32 %v1358_v24, %v474_v4 }
 0x149   :  { %p1226_p0 = pnand %p1225_p13, %p1219_p10 }
 0x14c   :  { %761 = vrot.lane.b32.xlu1 %v756_v13, %s1258_s7  ;;  %241 = vrot.lane.b32.xlu0 %v237_v16, %s1257_s5  ;;  %v586_v13 = vstv %s1062_s23 }
 0x14d   :  { %v587_v15 = vmul.f32 %v1358_v24, %v586_v13 }
 0x150   :  { %957 = vrot.lane.b32.xlu1 %v952_v47, %s1258_s7  ;;  %243 = vrot.lane.b32.xlu0 %v238_v14, %s1257_s5  ;;  %v588_v14 = vmul.f32 %v1360_v25, %v586_v13 }
 0x154   :  { %299 = vrot.lane.b32.xlu1 %v294_v48, %s1256_s30  ;;  %297 = vrot.lane.b32.xlu0 %v293_v20, %s1256_s30  ;;  %v670_v48 = vstv %s1071_s24 }
 0x158   :  { %355 = vrot.lane.b32.xlu1 %v350_v17, %s1258_s7  ;;  %353 = vrot.lane.b32.xlu0 %v349_v49, %s1258_s7  ;;  %v672_v17 = vmul.f32 %v1360_v25, %v670_v48  ;;  %v671_v49 = vmul.f32 %v1358_v24, %v670_v48  ;;  %v572_v48 = vstv %s1061_s8 }
 0x15c   :  { %439 = vrot.lane.b32.xlu1 %v434_v28, %s1257_s5  ;;  %437 = vrot.lane.b32.xlu0 %v433_v29, %s1257_s5 }
 0x160   :  { %495 = vrot.lane.b32.xlu1 %v490_v31, %s1256_s30  ;;  %493 = vrot.lane.b32.xlu0 %v489_v32, %s1256_s30  ;;  %v867_v31 = vmul.f32 %v1358_v24, %v866_v23  ;;  %v726_v32 = vstv %s1075_s2  ;;  %v574_v23 = vmul.f32 %v572_v48, %v1364_v27 }
 0x161   :  { %v727_v37 = vmul.f32 %v1358_v24, %v726_v32 }
 0x164   :  { %551 = vrot.lane.b32.xlu1 %v546_v34, %s1258_s7  ;;  %549 = vrot.lane.b32.xlu0 %v545_v35, %s1258_s7  ;;  %v728_v35 = vmul.f32 %v1360_v25, %v726_v32  ;;  %v656_v32 = vstv %s1070_s9 }
 0x168   :  { %635 = vrot.lane.b32.xlu1 %v630_v38, %s1257_s5  ;;  %633 = vrot.lane.b32.xlu0 %v629_v39, %s1257_s5  ;;  %v922_v38 = vstv %s1092_s26 }
 0x16c   :  { %831 = vrot.lane.b32.xlu1 %v826_v41, %s1257_s5  ;;  %829 = vrot.lane.b32.xlu0 %v825_v42, %s1257_s5  ;;  %v924_v41 = vmul.f32 %v1360_v25, %v922_v38  ;;  %v923_v42 = vmul.f32 %v1358_v24, %v922_v38 }
 0x170   :  { %691 = vrot.lane.b32.xlu1 %v686_v46, %s1256_s30  ;;  %689 = vrot.lane.b32.xlu0 %v685_v50, %s1256_s30 }
 0x174   :  { %887 = vrot.lane.b32.xlu1 %v882_v52, %s1256_s30  ;;  %885 = vrot.lane.b32.xlu0 %v881_v53, %s1256_s30  ;;  %v783_v52 = vmul.f32 %v1358_v24, %v782_v44  ;;  %v264_v53 = vstv %s1037_s27 }
 0x175   :  { %v265_v57 = vmul.f32 %v264_v53, %v1362_v26 }
 0x178   :  { %747 = vrot.lane.b32.xlu1 %v742_v55, %s1258_s7  ;;  %745 = vrot.lane.b32.xlu0 %v741_v56, %s1258_s7  ;;  %v266_v56 = vmul.f32 %v264_v53, %v1364_v27 }
 0x17c   :  { %943 = vrot.lane.b32.xlu1 %v938_v59, %s1258_s7  ;;  %941 = vrot.lane.b32.xlu0 %v937_v60, %s1258_s7 }
 0x180   :  { %285 = vrot.lane.b32.xlu1 %v280_v61, %s1257_s5  ;;  %283 = vrot.lane.b32.xlu0 %v279_v62, %s1257_s5  ;;  %v322_v61 = vmul.f32 %v320_v58, %v1364_v27  ;;  %v321_v62 = vmul.f32 %v320_v58, %v1362_v26 }
 0x184   :  { %341 = vrot.lane.b32.xlu1 %v336_v0, %s1256_s30  ;;  %339 = vrot.lane.b32.xlu0 %v335_v21, %s1256_s30 }
 0x188   :  { %397 = vrot.lane.b32.xlu1 %v392_v1, %s1258_s7  ;;  %395 = vrot.lane.b32.xlu0 %v391_v3, %s1258_s7  ;;  %v377_v1 = vmul.f32 %v376_v63, %v1362_v26  ;;  %v460_v3 = vstv %s1053_s29 }
 0x189   :  { %v461_v7 = vmul.f32 %v460_v3, %v1362_v26 }
 0x18c   :  { %481 = vrot.lane.b32.xlu1 %v476_v5, %s1257_s5  ;;  %479 = vrot.lane.b32.xlu0 %v475_v6, %s1257_s5  ;;  %v462_v6 = vmul.f32 %v460_v3, %v1364_v27 }
 0x190   :  { %537 = vrot.lane.b32.xlu1 %v532_v9, %s1256_s30  ;;  %535 = vrot.lane.b32.xlu0 %v531_v10, %s1256_s30  ;;  %v516_v9 = vstv %s1057_s6 }
 0x192   :  { %v1615_v16 = vpop.permute.xlu0 %311  ;;  %v1617_v47 = vpop.permute.xlu1 %255 }
 0x194   :  { %593 = vrot.lane.b32.xlu1 %v588_v14, %s1258_s7  ;;  %591 = vrot.lane.b32.xlu0 %v587_v15, %s1258_s7  ;;  %v518_v14 = vmul.f32 %v516_v9, %v1364_v27  ;;  %v517_v15 = vmul.f32 %v516_v9, %v1362_v26  ;;  %v768_v9 = vstv %s1078_s14 }
 0x196   :  { %v1623_v20 = vpop.permute.xlu0 %367  ;;  %v1625_v22 = vpop.permute.xlu1 %257 }
 0x198   :  { %677 = vrot.lane.b32.xlu1 %v672_v17, %s1257_s5  ;;  %675 = vrot.lane.b32.xlu0 %v671_v49, %s1257_s5 }
 0x19a   :  { %v1631_v28 = vpop.permute.xlu0 %451  ;;  %v1633_v29 = vpop.permute.xlu1 %313 }
 0x19c   :  { %873 = vrot.lane.b32.xlu1 %v868_v30, %s1257_s5  ;;  %871 = vrot.lane.b32.xlu0 %v867_v31, %s1257_s5  ;;  %v573_v30 = vmul.f32 %v572_v48, %v1362_v26 }
 0x19e   :  { %v1639_v33 = vpop.permute.xlu0 %507  ;;  %v1641_v34 = vpop.permute.xlu1 %369 }
 0x1a0   :  { %733 = vrot.lane.b32.xlu1 %v728_v35, %s1256_s30  ;;  %731 = vrot.lane.b32.xlu0 %v727_v37, %s1256_s30 }
 0x1a2   :  { %v1647_v39 = vpop.permute.xlu0 %563  ;;  %v1649_v40 = vpop.permute.xlu1 %453 }
 0x1a4   :  { %929 = vrot.lane.b32.xlu1 %v924_v41, %s1256_s30  ;;  %927 = vrot.lane.b32.xlu0 %v923_v42, %s1256_s30  ;;  %v658_v41 = vmul.f32 %v656_v32, %v1364_v27  ;;  %v657_v42 = vmul.f32 %v656_v32, %v1362_v26 }
 0x1a6   :  { %v1655_v46 = vpop.permute.xlu0 %647  ;;  %v1657_v50 = vpop.permute.xlu1 %509 }
 0x1a8   :  { %789 = vrot.lane.b32.xlu1 %v784_v51, %s1258_s7  ;;  %787 = vrot.lane.b32.xlu0 %v783_v52, %s1258_s7  ;;  %v852_v51 = vstv %s1087_s0 }
 0x1a9   :  { %v854_v53 = vmul.f32 %v852_v51, %v1364_v27 }
 0x1aa   :  { %v1663_v54 = vpop.permute.xlu0 %843  ;;  %v1665_v55 = vpop.permute.xlu1 %565 }
 0x1ac   :  { %271 = vrot.lane.b32.xlu1 %v266_v56, %s1257_s5  ;;  %269 = vrot.lane.b32.xlu0 %v265_v57, %s1257_s5  ;;  %v853_v56 = vmul.f32 %v852_v51, %v1362_v26  ;;  %v712_v57 = vstv %s1074_s10 }
 0x1ae   :  { %v1671_v59 = vpop.permute.xlu0 %703  ;;  %v1673_v60 = vpop.permute.xlu1 %649 }
 0x1b0   :  { %327 = vrot.lane.b32.xlu1 %v322_v61, %s1256_s30  ;;  %325 = vrot.lane.b32.xlu0 %v321_v62, %s1256_s30  ;;  %v713_v61 = vmul.f32 %v712_v57, %v1362_v26  ;;  %v908_v62 = vstv %s1091_s11 }
 0x1b1   :  { %v909_v3 = vmul.f32 %v908_v62, %v1362_v26 }
 0x1b2   :  { %v1679_v0 = vpop.permute.xlu0 %899  ;;  %v1681_v21 = vpop.permute.xlu1 %845 }
 0x1b4   :  { %383 = vrot.lane.b32.xlu1 %v378_v18, %s1258_s7  ;;  %381 = vrot.lane.b32.xlu0 %v377_v1, %s1258_s7  ;;  %v910_v1 = vmul.f32 %v908_v62, %v1364_v27 }
 0x1b6   :  { %v1687_v4 = vpop.permute.xlu0 %759  ;;  %v1689_v5 = vpop.permute.xlu1 %705 }
 0x1b7   :  { %1916 = vst [vmem:[#allocation17_spill] sm:$0xff] %v1687_v4 }
 0x1b8   :  { %467 = vrot.lane.b32.xlu1 %v462_v6, %s1257_s5  ;;  %465 = vrot.lane.b32.xlu0 %v461_v7, %s1257_s5 }
 0x1ba   :  { %v1695_v10 = vpop.permute.xlu0 %955  ;;  %v1697_v13 = vpop.permute.xlu1 %901 }
 0x1bb   :  { %1917 = vst [vmem:[#allocation18_spill] sm:$0xff] %v1695_v10 }
 0x1bc   :  { %523 = vrot.lane.b32.xlu1 %v518_v14, %s1256_s30  ;;  %521 = vrot.lane.b32.xlu0 %v517_v15, %s1256_s30 }
 0x1be   :  { %v1703_v17 = vpop.permute.xlu1 %761  ;;  %v242_v49 = vpop.permute.xlu0 %241 }
 0x1bf   :  { %1918 = vst [vmem:[#allocation19_spill] sm:$0xff] %v1703_v17  ;;  %v247_v31 = vadd.f32 %v242_v49, %v1467_v8 }
 0x1c0   :  { %579 = vrot.lane.b32.xlu1 %v574_v23, %s1258_s7  ;;  %577 = vrot.lane.b32.xlu0 %v573_v30, %s1258_s7  ;;  %v964_v23 = vstv %s1095_s15 }
 0x1c1   :  { %v1711_v35 = vadd.f32 %v1617_v47, %v247_v31  ;;  %v965_v31 = vmul.f32 %v964_v23, %v1362_v26 }
 0x1c2   :  { %v1713_v37 = vpop.permute.xlu1 %957  ;;  %v244_v38 = vpop.permute.xlu0 %243 }
 0x1c3   :  { %1919 = vst [vmem:[#allocation20_spill] sm:$0xff] %v1713_v37  ;;  %v248_v44 = vadd.f32 %v244_v38, %v1474_v19 }
 0x1c4   :  { %663 = vrot.lane.b32.xlu1 %v658_v41, %s1257_s5  ;;  %661 = vrot.lane.b32.xlu0 %v657_v42, %s1257_s5 }
 0x1c5   :  { %v1721_v8 = vadd.f32 %v1625_v22, %v248_v44  ;;  %v714_v22 = vmul.f32 %v712_v57, %v1364_v27 }
 0x1c6   :  { %v1723_v47 = vpop.permute.xlu1 %299  ;;  %v1725_v52 = vpop.permute.xlu0 %297 }
 0x1c8   :  { %859 = vrot.lane.b32.xlu1 %v854_v53, %s1257_s5  ;;  %857 = vrot.lane.b32.xlu0 %v853_v56, %s1257_s5  ;;  %s1096_s5 = sld [smem:[#allocation2 + $0x3f]] }
 0x1ca   :  { %v1731_v19 = vpop.permute.xlu1 %355  ;;  %v1733_v58 = vpop.permute.xlu0 %353 }
 0x1cc   :  { %719 = vrot.lane.b32.xlu1 %v714_v22, %s1256_s30  ;;  %717 = vrot.lane.b32.xlu0 %v713_v61, %s1256_s30 }
 0x1ce   :  { %v440_v63 = vpop.permute.xlu1 %439  ;;  %v438_v18 = vpop.permute.xlu0 %437  ;;  %v978_v32 = vstv %s1096_s5 }
 0x1cf   :  { %v444_v6 = vadd.f32 %v440_v63, %v1489_v36  ;;  %v443_v7 = vadd.f32 %v438_v18, %v1501_v45  ;;  %v770_v36 = vmul.f32 %v768_v9, %v1364_v27  ;;  %v769_v45 = vmul.f32 %v768_v9, %v1362_v26 }
 0x1d0   :  { %915 = vrot.lane.b32.xlu1 %v910_v1, %s1256_s30  ;;  %913 = vrot.lane.b32.xlu0 %v909_v3, %s1256_s30  ;;  %v980_v42 = vmul.f32 %v1360_v25, %v978_v32  ;;  %v979_v44 = vmul.f32 %v1358_v24, %v978_v32  ;;  %s403_s30 = sld [smem:[#allocation7]] }
 0x1d1   :  { %v1746_v14 = vadd.f32 %v1649_v40, %v444_v6  ;;  %v1749_v15 = vadd.f32 %v1631_v28, %v443_v7  ;;  %v966_v28 = vmul.f32 %v964_v23, %v1364_v27 }
 0x1d2   :  { %v1751_v48 = vpop.permute.xlu1 %495  ;;  %v1753_v49 = vpop.permute.xlu0 %493 }
 0x1d4   :  { %775 = vrot.lane.b32.xlu1 %v770_v36, %s1258_s7  ;;  %773 = vrot.lane.b32.xlu0 %v769_v45, %s1258_s7 }
 0x1d6   :  { %v1759_v30 = vpop.permute.xlu1 %551  ;;  %v1761_v40 = vpop.permute.xlu0 %549 }
 0x1d8   :  { %971 = vrot.lane.b32.xlu1 %v966_v28, %s1258_s7  ;;  %969 = vrot.lane.b32.xlu0 %v965_v31, %s1258_s7 }
 0x1da   :  { %v636_v38 = vpop.permute.xlu1 %635  ;;  %v634_v41 = vpop.permute.xlu0 %633 }
 0x1db   :  { %v640_v51 = vadd.f32 %v636_v38, %v1520_v43  ;;  %v639_v53 = vadd.f32 %v634_v41, %v1523_v2 }
 0x1dc   :  { %985 = vrot.lane.b32.xlu1 %v980_v42, %s1258_s7  ;;  %983 = vrot.lane.b32.xlu0 %v979_v44, %s1258_s7  ;;  %s1847_s7 = sld [smem:[#allocation7 + $0x1]] }
 0x1dd   :  { %v1774_v26 = vadd.f32 %v1673_v60, %v640_v51  ;;  %v1777_v27 = vadd.f32 %v1655_v46, %v639_v53 }
 0x1de   :  { %v832_v56 = vpop.permute.xlu1 %831  ;;  %v830_v57 = vpop.permute.xlu0 %829 }
 0x1df   :  { %v836_v25 = vadd.f32 %v832_v56, %v1535_v11  ;;  %v835_v24 = vadd.f32 %v830_v57, %v1537_v12 }
 0x1e1   :  { %v1782_v43 = vadd.f32 %v1681_v21, %v836_v25  ;;  %v1785_v2 = vadd.f32 %v1663_v54, %v835_v24 }
 0x1e2   :  { %v1787_v22 = vpop.permute.xlu1 %691  ;;  %v1789_v61 = vpop.permute.xlu0 %689 }
 0x1e6   :  { %v1791_v60 = vpop.permute.xlu1 %887  ;;  %v1793_v46 = vpop.permute.xlu0 %885 }
 0x1ea   :  { %v1795_v62 = vpop.permute.xlu1 %747  ;;  %v1797_v63 = vpop.permute.xlu0 %745 }
 0x1eb   :  { %1920 = vst [vmem:[#allocation21_spill] sm:$0xff] %v1795_v62  ;;  %1921 = vst [vmem:[#allocation22_spill] sm:$0xff] %v1797_v63 }
 0x1ee   :  { %v1799_v11 = vpop.permute.xlu1 %943  ;;  %v1801_v12 = vpop.permute.xlu0 %941 }
 0x1ef   :  { %1922 = vst [vmem:[#allocation23_spill] sm:$0xff] %v1799_v11  ;;  %1923 = vst [vmem:[#allocation24_spill] sm:$0xff] %v1801_v12 }
 0x1f2   :  { %v286_v21 = vpop.permute.xlu1 %285  ;;  %v284_v18 = vpop.permute.xlu0 %283 }
 0x1f6   :  { %v342_v54 = vpop.permute.xlu1 %341  ;;  %v340_v1 = vpop.permute.xlu0 %339 }
 0x1fa   :  { %v398_v3 = vpop.permute.xlu1 %397  ;;  %v396_v6 = vpop.permute.xlu0 %395 }
 0x1fe   :  { %v482_v7 = vpop.permute.xlu1 %481  ;;  %v480_v9 = vpop.permute.xlu0 %479 }
 0x202   :  { %v1803_v36 = vpop.permute.xlu1 %537  ;;  %v1805_v45 = vpop.permute.xlu0 %535 }
 0x206   :  { %v1807_v23 = vpop.permute.xlu1 %593  ;;  %v1809_v28 = vpop.permute.xlu0 %591 }
 0x20a   :  { %v1811_v31 = vpop.permute.xlu1 %677  ;;  %v1813_v32 = vpop.permute.xlu0 %675 }
 0x20e   :  { %v1815_v38 = vpop.permute.xlu1 %873  ;;  %v1817_v41 = vpop.permute.xlu0 %871 }
 0x212   :  { %v1819_v42 = vpop.permute.xlu1 %733  ;;  %v1821_v44 = vpop.permute.xlu0 %731 }
 0x213   :  { %1924 = vst [vmem:[#allocation25_spill] sm:$0xff] %v1819_v42  ;;  %1925 = vst [vmem:[#allocation26_spill] sm:$0xff] %v1821_v44 }
 0x216   :  { %v1823_v51 = vpop.permute.xlu1 %929  ;;  %v1825_v53 = vpop.permute.xlu0 %927 }
 0x217   :  { %1926 = vst [vmem:[#allocation27_spill] sm:$0xff] %v1823_v51  ;;  %1927 = vst [vmem:[#allocation28_spill] sm:$0xff] %v1825_v53 }
 0x21a   :  { %v1827_v56 = vpop.permute.xlu1 %789  ;;  %v1829_v57 = vpop.permute.xlu0 %787 }
 0x21b   :  { %1928 = vst [vmem:[#allocation29_spill] sm:$0xff] %v1827_v56  ;;  %1929 = vst [vmem:[#allocation30_spill] sm:$0xff] %v1829_v57 }
 0x21e   :  { %v272_v25 = vpop.permute.xlu1 %271  ;;  %v270_v24 = vpop.permute.xlu0 %269 }
 0x21f   :  { %v276_v10 = vadd.f32 %v272_v25, %v1721_v8  ;;  %v275_v37 = vadd.f32 %v270_v24, %v1711_v35 }
 0x221   :  { %v290_v12 = vadd.f32 %v286_v21, %v276_v10  ;;  %v289_v11 = vadd.f32 %v284_v18, %v275_v37 }
 0x222   :  { %v328_v4 = vpop.permute.xlu1 %327  ;;  %v326_v17 = vpop.permute.xlu0 %325 }
 0x223   :  { %v304_v63 = vadd.f32 %v1723_v47, %v290_v12  ;;  %v303_v51 = vadd.f32 %v1725_v52, %v289_v11 }
 0x225   :  { %v318_v53 = vadd.f32 %v1633_v29, %v304_v63  ;;  %v317_v56 = vadd.f32 %v1615_v16, %v303_v51 }
 0x226   :  { %v384_v62 = vpop.permute.xlu1 %383  ;;  %v382_v57 = vpop.permute.xlu0 %381 }
 0x227   :  { %v332_v44 = vadd.f32 %v328_v4, %v318_v53  ;;  %v331_v42 = vadd.f32 %v326_v17, %v317_v56 }
 0x229   :  { %v346_v8 = vadd.f32 %v342_v54, %v332_v44  ;;  %v345_v25 = vadd.f32 %v340_v1, %v331_v42  ;;  %v404_v1 = vstv %s403_s30 }
 0x22a   :  { %v468_v35 = vpop.permute.xlu1 %467  ;;  %v466_v10 = vpop.permute.xlu0 %465 }
 0x22b   :  { %v360_v37 = vadd.f32 %v1731_v19, %v346_v8  ;;  %v359_v21 = vadd.f32 %v1733_v58, %v345_v25  ;;  %v472_v47 = vadd.f32 %v468_v35, %v1746_v14  ;;  %v471_v52 = vadd.f32 %v466_v10, %v1749_v15 }
 0x22c   :  { %v600_v10 = vstv %s1847_s7 }
 0x22d   :  { %v374_v29 = vadd.f32 %v1641_v34, %v360_v37  ;;  %v373_v16 = vadd.f32 %v1623_v20, %v359_v21  ;;  %v486_v63 = vadd.f32 %v482_v7, %v472_v47  ;;  %v485_v4 = vadd.f32 %v480_v9, %v471_v52 }
 0x22e   :  { %v524_v17 = vpop.permute.xlu1 %523  ;;  %v522_v11 = vpop.permute.xlu0 %521 }
 0x22f   :  { %v388_v12 = vadd.f32 %v384_v62, %v374_v29  ;;  %v387_v18 = vadd.f32 %v382_v57, %v373_v16  ;;  %v500_v54 = vadd.f32 %v1751_v48, %v486_v63  ;;  %v499_v19 = vadd.f32 %v1753_v49, %v485_v4 }
 0x231   :  { %v402_v58 = vadd.f32 %v398_v3, %v388_v12  ;;  %v401_v42 = vadd.f32 %v396_v6, %v387_v18  ;;  %v514_v14 = vadd.f32 %v1657_v50, %v500_v54  ;;  %v513_v15 = vadd.f32 %v1639_v33, %v499_v19  ;;  %v1933_v12 = vld [vmem:[#allocation22_spill] sm:$0xff]  ;;  %v1934_v54 = vld [vmem:[#allocation27_spill] sm:$0xff] }
 0x232   :  { %v580_v34 = vpop.permute.xlu1 %579  ;;  %v578_v20 = vpop.permute.xlu0 %577 }
 0x233   :  { %v406_v7 = vadd.f32 %v404_v1, %v402_v58  ;;  %v405_v9 = vadd.f32 %v404_v1, %v401_v42  ;;  %v528_v44 = vadd.f32 %v524_v17, %v514_v14  ;;  %v527_v51 = vadd.f32 %v522_v11, %v513_v15  ;;  %v1935_v1 = vld [vmem:[#allocation28_spill] sm:$0xff]  ;;  %v1937_v14 = vld [vmem:[#allocation17_spill] sm:$0xff] }
 0x235   :  { %1000 = vst.msk [vmem:[#allocation11 + $0x20] sm:$0xff] %vm995_vm1, %v406_v7  ;;  %996 = vst.msk [vmem:[#allocation11] sm:$0xff] %vm995_vm1, %v405_v9  ;;  %v542_v48 = vadd.f32 %v1803_v36, %v528_v44  ;;  %v541_v49 = vadd.f32 %v1805_v45, %v527_v51  ;;  %v1939_v9 = vld [vmem:[#allocation24_spill] sm:$0xff] }
 0x236   :  { %v664_v50 = vpop.permute.xlu1 %663  ;;  %v662_v33 = vpop.permute.xlu0 %661 }
 0x237   :  { %v556_v62 = vadd.f32 %v1759_v30, %v542_v48  ;;  %v555_v3 = vadd.f32 %v1761_v40, %v541_v49  ;;  %v668_v6 = vadd.f32 %v664_v50, %v1774_v26  ;;  %v667_v53 = vadd.f32 %v662_v33, %v1777_v27  ;;  %v1940_v50 = vld [vmem:[#allocation20_spill] sm:$0xff] }
 0x238   :  { %v796_v49 = vstv %s1080_s16 }
 0x239   :  { %v570_v56 = vadd.f32 %v1665_v55, %v556_v62  ;;  %v569_v57 = vadd.f32 %v1647_v39, %v555_v3  ;;  %v682_v24 = vadd.f32 %v1811_v31, %v668_v6  ;;  %v681_v36 = vadd.f32 %v1813_v32, %v667_v53  ;;  %v1941_v62 = vld [vmem:[#allocation18_spill] sm:$0xff]  ;;  %v1942_v6 = vld [vmem:[#allocation29_spill] sm:$0xff] }
 0x23a   :  { %v860_v45 = vpop.permute.xlu1 %859  ;;  %v858_v8 = vpop.permute.xlu0 %857 }
 0x23b   :  { %v584_v25 = vadd.f32 %v580_v34, %v570_v56  ;;  %v583_v35 = vadd.f32 %v578_v20, %v569_v57  ;;  %v864_v30 = vadd.f32 %v860_v45, %v1782_v43  ;;  %v863_v40 = vadd.f32 %v858_v8, %v1785_v2  ;;  %v1938_v20 = vld [vmem:[#allocation23_spill] sm:$0xff]  ;;  %v1943_v56 = vld [vmem:[#allocation30_spill] sm:$0xff] }
 0x23c   :  { %v696_v26 = vadd.f32 %v1787_v22, %v682_v24  ;;  %v695_v27 = vadd.f32 %v1789_v61, %v681_v36 }
 0x23d   :  { %v598_v55 = vadd.f32 %v1807_v23, %v584_v25  ;;  %v597_v39 = vadd.f32 %v1809_v28, %v583_v35  ;;  %v878_v31 = vadd.f32 %v1815_v38, %v864_v30  ;;  %v877_v32 = vadd.f32 %v1817_v41, %v863_v40  ;;  %v1930_v38 = vld [vmem:[#allocation25_spill] sm:$0xff]  ;;  %v1931_v41 = vld [vmem:[#allocation26_spill] sm:$0xff] }
 0x23e   :  { %v710_v37 = vadd.f32 %v1689_v5, %v696_v26  ;;  %v720_v21 = vpop.permute.xlu1 %719  ;;  %v709_v43 = vadd.f32 %v1671_v59, %v695_v27  ;;  %v718_v47 = vpop.permute.xlu0 %717  ;;  %v992_v30 = vstv %s1097_s17 }
 0x23f   :  { %v602_v2 = vadd.f32 %v600_v10, %v598_v55  ;;  %v601_v52 = vadd.f32 %v600_v10, %v597_v39  ;;  %v892_v22 = vadd.f32 %v1791_v60, %v878_v31  ;;  %v891_v61 = vadd.f32 %v1793_v46, %v877_v32  ;;  %v1932_v46 = vld [vmem:[#allocation21_spill] sm:$0xff] }
 0x240   :  { %v724_v29 = vadd.f32 %v720_v21, %v710_v37  ;;  %v723_v23 = vadd.f32 %v718_v47, %v709_v43 }
 0x241   :  { %1001 = vst.msk [vmem:[#allocation11 + $0x28] sm:$0xff] %vm995_vm1, %v602_v2  ;;  %997 = vst.msk [vmem:[#allocation11 + $0x8] sm:$0xff] %vm995_vm1, %v601_v52  ;;  %v906_v28 = vadd.f32 %v1697_v13, %v892_v22  ;;  %v905_v5 = vadd.f32 %v1679_v0, %v891_v61  ;;  %v1936_v13 = vld [vmem:[#allocation19_spill] sm:$0xff] }
 0x242   :  { %v738_v59 = vadd.f32 %v1930_v38, %v724_v29  ;;  %v737_v16 = vadd.f32 %v1931_v41, %v723_v23  ;;  %v916_v63 = vpop.permute.xlu1 %915  ;;  %v914_v4 = vpop.permute.xlu0 %913 }
 0x243   :  { %v920_v60 = vadd.f32 %v916_v63, %v906_v28  ;;  %v919_v17 = vadd.f32 %v914_v4, %v905_v5 }
 0x244   :  { %v752_v11 = vadd.f32 %v1932_v46, %v738_v59  ;;  %v751_v18 = vadd.f32 %v1933_v12, %v737_v16 }
 0x245   :  { %v934_v19 = vadd.f32 %v1934_v54, %v920_v60  ;;  %v933_v58 = vadd.f32 %v1935_v1, %v919_v17 }
 0x246   :  { %v766_v42 = vadd.f32 %v1936_v13, %v752_v11  ;;  %v776_v0 = vpop.permute.xlu1 %775  ;;  %v765_v15 = vadd.f32 %v1937_v14, %v751_v18  ;;  %v774_v34 = vpop.permute.xlu0 %773 }
 0x247   :  { %v948_v7 = vadd.f32 %v1938_v20, %v934_v19  ;;  %v947_v44 = vadd.f32 %v1939_v9, %v933_v58 }
 0x248   :  { %v780_v51 = vadd.f32 %v776_v0, %v766_v42  ;;  %v779_v48 = vadd.f32 %v774_v34, %v765_v15 }
 0x249   :  { %v962_v33 = vadd.f32 %v1940_v50, %v948_v7  ;;  %v961_v3 = vadd.f32 %v1941_v62, %v947_v44 }
 0x24a   :  { %v794_v53 = vadd.f32 %v1942_v6, %v780_v51  ;;  %v793_v57 = vadd.f32 %v1943_v56, %v779_v48  ;;  %v972_v24 = vpop.permute.xlu1 %971  ;;  %v970_v36 = vpop.permute.xlu0 %969 }
 0x24b   :  { %v976_v25 = vadd.f32 %v972_v24, %v962_v33  ;;  %v975_v35 = vadd.f32 %v970_v36, %v961_v3 }
 0x24c   :  { %v798_v45 = vadd.f32 %v796_v49, %v794_v53  ;;  %v797_v8 = vadd.f32 %v796_v49, %v793_v57 }
 0x24e   :  { %1002 = vst.msk [vmem:[#allocation11 + $0x30] sm:$0xff] %vm995_vm1, %v798_v45  ;;  %998 = vst.msk [vmem:[#allocation11 + $0x10] sm:$0xff] %vm995_vm1, %v797_v8  ;;  %v986_v40 = vpop.permute.xlu1 %985  ;;  %v984_v10 = vpop.permute.xlu0 %983 }
 0x24f   :  { %v990_v26 = vadd.f32 %v986_v40, %v976_v25  ;;  %v989_v27 = vadd.f32 %v984_v10, %v975_v35 }
 0x251   :  { %v994_v55 = vadd.f32 %v992_v30, %v990_v26  ;;  %v993_v39 = vadd.f32 %v992_v30, %v989_v27 }
 0x253   :  { %1003 = vst.msk [vmem:[#allocation11 + $0x38] sm:$0xff] %vm995_vm1, %v994_v55  ;;  %999 = vst.msk [vmem:[#allocation11 + $0x18] sm:$0xff] %vm995_vm1, %v993_v39 }
 0x254   :  { %1229 = shalt.err (!%p1226_p0)
}
 0x255   :  { %s1230_s23 = scalar_lea.hbm %s1915_s4, 1024 }
 0x256   :  { %p1231_p1 = scmp.ne.s32.totalorder %s1915_s4, %s1230_s23  ;;  %p1234_p2 = scmp.lt.u32.totalorder %s1230_s23, %s1915_s4 }
 0x258   :  { %p1236_p3 = pnand %p1234_p2, %p1231_p1 }
 0x25a   :  { %1239 = shalt.err (!%p1236_p3)
}
 0x25b   :  { %1015 = dma.vmem_to_hbm [thread:$0]  %s1010_s19, 1024, %s1915_s4, [#allocation4], %s1253_s12, %s1253_s12, %s1254_s13  }
 0x25c   :  { %1248 = dma.done.wait [#allocation4], 1024  }
 0x25d   :  { %1249 = vsyncadd [#allocation4], 4294966272 }
 0x25e   :  { %1019 = vsyncpa [#allocation3], 1 }
 0x25f   :  { %1020 = vsyncpa [#allocation10], 1 }
 0x260   :  { %1021 = vsyncpa [#allocation4], 1 }
 0x261   :  { %1022 = vsyncpa [#allocation5], 1 }
 0x262   :  { %1023 = vsyncpa [#allocation6], 1 }

</bundles_post_ra>
